<compile_context>
chip_gen: v7x
topology: tpu7x:2x2x1
jax: 0.10.0
libtpu: 0.0.40
codegen_flags: <defaults>
</compile_context>

<pallas_src>
import jax
import jax.numpy as jnp
from jax import lax
from jax.experimental import pallas as pl
from jax.experimental.pallas import tpu as pltpu


# ---------------------------------------------------------------------------
# Kernels: MLP towers on transposed [features, tokens] tiles (tokens on lanes)
# ---------------------------------------------------------------------------

def _dot(w, h):
    # W: [out, in], h: [in, TM]  ->  [out, TM], f32 accumulation, pinned precision.
    return jnp.dot(w, h, preferred_element_type=jnp.float32,
                   precision=lax.Precision.DEFAULT)


def relational_mlp_kernel(x_ref, w1_ref, b1_ref, w2_ref, b2_ref,
                          w3_ref, b3_ref, w4_ref, b4_ref, o_ref):
    # x_ref: [Din, TM] tile (tokens on the lane axis).
    # Layer k (transposed): h_k = relu(W_k @ h_{k-1} + b_k), W_k is [out, in].
    x = x_ref[...]
    h = jnp.maximum(_dot(w1_ref[...], x) + b1_ref[...], 0.0)
    h = jnp.maximum(_dot(w2_ref[...], h) + b2_ref[...], 0.0)
    h = jnp.maximum(_dot(w3_ref[...], h) + b3_ref[...], 0.0)
    y = jnp.maximum(_dot(w4_ref[...], h) + b4_ref[...], 0.0)
    o_ref[...] = y.astype(o_ref.dtype)


def object_mlp_kernel(x_ref, w1_ref, b1_ref, w2_ref, b2_ref, o_ref):
    # x_ref: [Din, TM] tile.  Linear -> ReLU -> Linear (no final activation).
    x = x_ref[...]
    h = jnp.maximum(_dot(w1_ref[...], x) + b1_ref[...], 0.0)
    y = _dot(w2_ref[...], h) + b2_ref[...]
    o_ref[...] = y.astype(o_ref.dtype)


# ---------------------------------------------------------------------------
# Pallas-call wrapper: tile the (transposed) token axis on lanes
# ---------------------------------------------------------------------------

def _cdiv(a, b):
    return -(-a // b)


def _choose_token_tile(m, lane_tile):
    """Pick (tm, m_pad).  For m <= lane_tile: one full block (any width legal).
    For m > lane_tile: balanced 128-aligned tiles so multi-TC sharding gets
    equal work (avoids one full tile + one mostly-padded remainder)."""
    if m <= lane_tile:
        return m, m
    n_tiles = _cdiv(m, lane_tile)                 # >= 2
    tm = _cdiv(_cdiv(m, n_tiles), 128) * 128      # balanced, lane-dense
    n_tiles = _cdiv(m, tm)
    return tm, n_tiles * tm


def _mlp_transposed(kernel, x_t, layers, out_dim, *, lane_tile=4096):
    """Run `kernel` over x_t: [features, M]; tokens (M) tiled on the lane axis.

    layers: list of (w, b) with w: [out, in] (PyTorch layout), b: [out, 1].
    Returns [out_dim, M].
    """
    d_in, m = x_t.shape

    tm, m_pad = _choose_token_tile(m, lane_tile)
    if m_pad != m:
        # Padded token columns compute relu(bias) garbage; sliced off below
        # before any downstream reshape consumes the slab.
        x_t = jnp.pad(x_t, ((0, 0), (0, m_pad - m)))
    grid = (m_pad // tm,)

    in_specs = [pl.BlockSpec((d_in, tm), lambda i: (0, i))]
    args = [x_t]
    for w, b in layers:
        # Constant index_map -> same (tiny) weight/bias block every step.
        # (Optional: pipeline_mode=pl.Buffered(1) to drop their double buffers.)
        in_specs.append(pl.BlockSpec(w.shape, lambda i: (0, 0)))
        in_specs.append(pl.BlockSpec(b.shape, lambda i: (0, 0)))
        args += [w, b]

    out = pl.pallas_call(
        kernel,
        out_shape=jax.ShapeDtypeStruct((out_dim, m_pad), x_t.dtype),
        grid_spec=pltpu.PrefetchScalarGridSpec(
            num_scalar_prefetch=0,
            grid=grid,
            in_specs=in_specs,
            out_specs=pl.BlockSpec((out_dim, tm), lambda i: (0, i)),
        ),
        compiler_params=pltpu.CompilerParams(
            # Token tiles are independent -> megacore / dual-TC sharding.
            dimension_semantics=("parallel",),
            # Explicit headroom over v5e's 16 MiB scoped default; matches
            # v6e/v7x defaults and stays well under v7x's 64 MiB physical.
            vmem_limit_bytes=32 * 1024 * 1024,
        ),
    )(*args)
    if m_pad != m:
        out = out[:, :m]
    return out


# ---------------------------------------------------------------------------
# Full InteractionNetwork forward (all large activations stay feature-major)
# ---------------------------------------------------------------------------

def interaction_network_forward(objects, sender_relations, receiver_relations,
                                relation_info, params):
    """objects: [B, N, Do]; sender/receiver_relations: [B, N, R];
    relation_info: [B, R, Dr]  ->  [B*N, 2]."""
    b, n_obj, d_obj = objects.shape
    n_rel = sender_relations.shape[2]
    d_rel = relation_info.shape[2]
    effect_dim = params["rel"][-1][0].shape[0]

    # Feature-major glue: the incidence bmm's emit [feature, B, R] directly, so
    # the big [Din, B*R] kernel input is formed without an HBM transpose pass.
    senders_t = jnp.einsum("bor,bod->dbr", sender_relations, objects)       # [Do, B, R]
    receivers_t = jnp.einsum("bor,bod->dbr", receiver_relations, objects)   # [Do, B, R]
    rel_info_t = jnp.transpose(relation_info, (2, 0, 1))                    # [Dr, B, R] (tiny)
    rel_x_t = jnp.concatenate(
        [senders_t.reshape(d_obj, b * n_rel),
         receivers_t.reshape(d_obj, b * n_rel),
         rel_info_t.reshape(d_rel, b * n_rel)], axis=0)                     # [2Do+Dr, B*R]

    effects_t = _mlp_transposed(relational_mlp_kernel, rel_x_t,
                                params["rel"], effect_dim)                  # [E, B*R]

    # Receiver aggregation consumes effects_t in place (no .T of the [E, B*R] slab).
    effects_ebr = effects_t.reshape(effect_dim, b, n_rel)                   # [E, B, R]
    eff_recv_t = jnp.einsum("bnr,ebr->ebn",
                            receiver_relations, effects_ebr)                # [E, B, N]
    objects_t = jnp.transpose(objects, (2, 0, 1))                           # [Do, B, N] (tiny)
    obj_x_t = jnp.concatenate(
        [objects_t.reshape(d_obj, b * n_obj),
         eff_recv_t.reshape(effect_dim, b * n_obj)], axis=0)                # [Do+E, B*N]

    pred_t = _mlp_transposed(object_mlp_kernel, obj_x_t, params["obj"], 2)  # [2, B*N]
    return pred_t.T                                                         # [B*N, 2] (tiny)


# ---------------------------------------------------------------------------
# Parameters (PyTorch nn.Linear default init: U(-1/sqrt(fan_in), 1/sqrt(fan_in)))
# ---------------------------------------------------------------------------

def _linear_init(key, fan_in, fan_out, dtype=jnp.float32):
    kw, kb = jax.random.split(key)
    bound = 1.0 / (float(fan_in) ** 0.5)
    w = jax.random.uniform(kw, (fan_out, fan_in), dtype, -bound, bound)  # [out, in]
    b = jax.random.uniform(kb, (fan_out, 1), dtype, -bound, bound)       # [out, 1]
    return w, b


def init_params(key, object_dim, relation_dim, effect_dim,
                rel_hidden=150, obj_hidden=100):
    ks = jax.random.split(key, 6)
    rel_in = 2 * object_dim + relation_dim
    obj_in = object_dim + effect_dim
    rel = [
        _linear_init(ks[0], rel_in, rel_hidden),
        _linear_init(ks[1], rel_hidden, rel_hidden),
        _linear_init(ks[2], rel_hidden, rel_hidden),
        _linear_init(ks[3], rel_hidden, effect_dim),
    ]
    obj = [
        _linear_init(ks[4], obj_in, obj_hidden),
        _linear_init(ks[5], obj_hidden, 2),
    ]
    return {"rel": rel, "obj": obj}


# ---------------------------------------------------------------------------
# Pure-JAX reference of the same forward pass
# ---------------------------------------------------------------------------

def reference_forward(objects, sender_relations, receiver_relations,
                      relation_info, params):
    senders = jnp.einsum("bor,bod->brd", sender_relations, objects)
    receivers = jnp.einsum("bor,bod->brd", receiver_relations, objects)
    x = jnp.concatenate([senders, receivers, relation_info], axis=2)
    h = x.reshape(-1, x.shape[-1])
    for w, b in params["rel"]:
        h = jnp.maximum(h @ w.T + b[:, 0], 0.0)
    effects = h.reshape(objects.shape[0], -1, h.shape[-1])
    er = jnp.einsum("bor,brd->bod", receiver_relations, effects)
    y = jnp.concatenate([objects, er], axis=2)
    y = y.reshape(-1, y.shape[-1])
    (w1, b1), (w2, b2) = params["obj"]
    y = jnp.maximum(y @ w1.T + b1[:, 0], 0.0)
    return y @ w2.T + b2[:, 0]


if __name__ == "__main__":
    # Spec constants: n_objects=3, n_relations=6, object_dim=5, relation_dim=1,
    # effect_dim=100 (RelationalModel hidden=150, ObjectModel hidden=100).
    n_objects = 3
    n_relations = n_objects * (n_objects - 1)
    object_dim = 5
    relation_dim = 1
    effect_dim = 100
    batch_size = 2

    key = jax.random.PRNGKey(0)
    k_obj, k_rel, k_par = jax.random.split(key, 3)

    objects = jax.random.normal(
        k_obj, (batch_size, n_objects, object_dim), jnp.float32)
    relation_info = jax.random.normal(
        k_rel, (batch_size, n_relations, relation_dim), jnp.float32)

    # One-hot sender/receiver incidence matrices over the 6 ordered object pairs.
    sr = jnp.zeros((n_objects, n_relations), jnp.float32)
    rr = jnp.zeros((n_objects, n_relations), jnp.float32)
    r = 0
    for i in range(n_objects):
        for j in range(n_objects):
            if i == j:
                continue
            sr = sr.at[i, r].set(1.0)
            rr = rr.at[j, r].set(1.0)
            r += 1
    sender_relations = jnp.broadcast_to(
        sr[None], (batch_size, n_objects, n_relations))
    receiver_relations = jnp.broadcast_to(
        rr[None], (batch_size, n_objects, n_relations))

    params = init_params(k_par, object_dim, relation_dim, effect_dim)

    out = interaction_network_forward(
        objects, sender_relations, receiver_relations, relation_info, params)
    out = jax.block_until_ready(out)

    ref = reference_forward(
        objects, sender_relations, receiver_relations, relation_info, params)

    assert out.shape == (batch_size * n_objects, 2), out.shape
    max_err = float(jnp.max(jnp.abs(out - ref)))
    assert jnp.allclose(out, ref, atol=2e-4, rtol=2e-4), f"max abs err = {max_err}"

    print("KERNEL_OK")
</pallas_src>

<mosaic_0001>
module attributes {stable_mosaic.version = 11 : i64} {
  func.func @relational_mlp_kernel(%arg0: i32, %arg1: memref<11x12xf32, #tpu.memory_space<vmem>>, %arg2: memref<150x11xf32, #tpu.memory_space<vmem>>, %arg3: memref<150x1xf32, #tpu.memory_space<vmem>>, %arg4: memref<150x150xf32, #tpu.memory_space<vmem>>, %arg5: memref<150x1xf32, #tpu.memory_space<vmem>>, %arg6: memref<150x150xf32, #tpu.memory_space<vmem>>, %arg7: memref<150x1xf32, #tpu.memory_space<vmem>>, %arg8: memref<100x150xf32, #tpu.memory_space<vmem>>, %arg9: memref<100x1xf32, #tpu.memory_space<vmem>>, %arg10: memref<100x12xf32, #tpu.memory_space<vmem>>) attributes {dimension_semantics = [#tpu.dimension_semantics<parallel>], iteration_bounds = array<i64: 1>, scalar_prefetch = 0 : i64, scratch_operands = 0 : i64, tpu.core_type = #tpu.core_type<tc>, window_params = [{transform_indices = @transform_0, window_bounds = array<i64: 11, 12>}, {pipeline_mode = #tpu.pipeline_mode<synchronous>, transform_indices = @transform_1, window_bounds = array<i64: 150, 11>}, {pipeline_mode = #tpu.pipeline_mode<synchronous>, transform_indices = @transform_2, window_bounds = array<i64: 150, 1>}, {pipeline_mode = #tpu.pipeline_mode<synchronous>, transform_indices = @transform_3, window_bounds = array<i64: 150, 150>}, {pipeline_mode = #tpu.pipeline_mode<synchronous>, transform_indices = @transform_4, window_bounds = array<i64: 150, 1>}, {pipeline_mode = #tpu.pipeline_mode<synchronous>, transform_indices = @transform_5, window_bounds = array<i64: 150, 150>}, {pipeline_mode = #tpu.pipeline_mode<synchronous>, transform_indices = @transform_6, window_bounds = array<i64: 150, 1>}, {pipeline_mode = #tpu.pipeline_mode<synchronous>, transform_indices = @transform_7, window_bounds = array<i64: 100, 150>}, {pipeline_mode = #tpu.pipeline_mode<synchronous>, transform_indices = @transform_8, window_bounds = array<i64: 100, 1>}, {transform_indices = @transform_9, window_bounds = array<i64: 100, 12>}]} {
    %c0 = arith.constant 0 : index
    %c0_0 = arith.constant 0 : index
    %0 = vector.load %arg1[%c0, %c0_0] : memref<11x12xf32, #tpu.memory_space<vmem>>, vector<11x12xf32>
    %c0_1 = arith.constant 0 : index
    %c0_2 = arith.constant 0 : index
    %1 = vector.load %arg2[%c0_1, %c0_2] : memref<150x11xf32, #tpu.memory_space<vmem>>, vector<150x11xf32>
    %cst = arith.constant dense<0.000000e+00> : vector<150x12xf32>
    %2 = tpu.matmul %1, %0, %cst {dimension_numbers = #tpu.dot_dimension_numbers<[1], [0], [0], [1], [0, 0, 1, 1], [], []>} : vector<150x11xf32>, vector<11x12xf32>, vector<150x12xf32> -> vector<150x12xf32>
    %c0_3 = arith.constant 0 : index
    %c0_4 = arith.constant 0 : index
    %3 = vector.load %arg3[%c0_3, %c0_4] : memref<150x1xf32, #tpu.memory_space<vmem>>, vector<150x1xf32>
    %4 = vector.broadcast %3 : vector<150x1xf32> to vector<150x12xf32>
    %5 = arith.addf %2, %4 : vector<150x12xf32>
    %cst_5 = arith.constant 0.000000e+00 : f32
    %6 = vector.broadcast %cst_5 : f32 to vector<150x12xf32>
    %7 = arith.maximumf %5, %6 : vector<150x12xf32>
    %c0_6 = arith.constant 0 : index
    %c0_7 = arith.constant 0 : index
    %8 = vector.load %arg4[%c0_6, %c0_7] : memref<150x150xf32, #tpu.memory_space<vmem>>, vector<150x150xf32>
    %cst_8 = arith.constant dense<0.000000e+00> : vector<150x12xf32>
    %9 = tpu.matmul %8, %7, %cst_8 {dimension_numbers = #tpu.dot_dimension_numbers<[1], [0], [0], [1], [0, 0, 1, 1], [], []>} : vector<150x150xf32>, vector<150x12xf32>, vector<150x12xf32> -> vector<150x12xf32>
    %c0_9 = arith.constant 0 : index
    %c0_10 = arith.constant 0 : index
    %10 = vector.load %arg5[%c0_9, %c0_10] : memref<150x1xf32, #tpu.memory_space<vmem>>, vector<150x1xf32>
    %11 = vector.broadcast %10 : vector<150x1xf32> to vector<150x12xf32>
    %12 = arith.addf %9, %11 : vector<150x12xf32>
    %cst_11 = arith.constant 0.000000e+00 : f32
    %13 = vector.broadcast %cst_11 : f32 to vector<150x12xf32>
    %14 = arith.maximumf %12, %13 : vector<150x12xf32>
    %c0_12 = arith.constant 0 : index
    %c0_13 = arith.constant 0 : index
    %15 = vector.load %arg6[%c0_12, %c0_13] : memref<150x150xf32, #tpu.memory_space<vmem>>, vector<150x150xf32>
    %cst_14 = arith.constant dense<0.000000e+00> : vector<150x12xf32>
    %16 = tpu.matmul %15, %14, %cst_14 {dimension_numbers = #tpu.dot_dimension_numbers<[1], [0], [0], [1], [0, 0, 1, 1], [], []>} : vector<150x150xf32>, vector<150x12xf32>, vector<150x12xf32> -> vector<150x12xf32>
    %c0_15 = arith.constant 0 : index
    %c0_16 = arith.constant 0 : index
    %17 = vector.load %arg7[%c0_15, %c0_16] : memref<150x1xf32, #tpu.memory_space<vmem>>, vector<150x1xf32>
    %18 = vector.broadcast %17 : vector<150x1xf32> to vector<150x12xf32>
    %19 = arith.addf %16, %18 : vector<150x12xf32>
    %cst_17 = arith.constant 0.000000e+00 : f32
    %20 = vector.broadcast %cst_17 : f32 to vector<150x12xf32>
    %21 = arith.maximumf %19, %20 : vector<150x12xf32>
    %c0_18 = arith.constant 0 : index
    %c0_19 = arith.constant 0 : index
    %22 = vector.load %arg8[%c0_18, %c0_19] : memref<100x150xf32, #tpu.memory_space<vmem>>, vector<100x150xf32>
    %cst_20 = arith.constant dense<0.000000e+00> : vector<100x12xf32>
    %23 = tpu.matmul %22, %21, %cst_20 {dimension_numbers = #tpu.dot_dimension_numbers<[1], [0], [0], [1], [0, 0, 1, 1], [], []>} : vector<100x150xf32>, vector<150x12xf32>, vector<100x12xf32> -> vector<100x12xf32>
    %c0_21 = arith.constant 0 : index
    %c0_22 = arith.constant 0 : index
    %24 = vector.load %arg9[%c0_21, %c0_22] : memref<100x1xf32, #tpu.memory_space<vmem>>, vector<100x1xf32>
    %25 = vector.broadcast %24 : vector<100x1xf32> to vector<100x12xf32>
    %26 = arith.addf %23, %25 : vector<100x12xf32>
    %cst_23 = arith.constant 0.000000e+00 : f32
    %27 = vector.broadcast %cst_23 : f32 to vector<100x12xf32>
    %28 = arith.maximumf %26, %27 : vector<100x12xf32>
    %c0_24 = arith.constant 0 : index
    %c0_25 = arith.constant 0 : index
    %29 = vector.load %arg10[%c0_24, %c0_25] : memref<100x12xf32, #tpu.memory_space<vmem>>, vector<100x12xf32>
    tpu.vector_store %arg10[%c0_24, %c0_25], %28 {strides = array<i32>} : memref<100x12xf32, #tpu.memory_space<vmem>>, vector<100x12xf32>,
    return
  }
  func.func @transform_0(%arg0: i32) -> (i32, i32) {
    %c0_i32 = arith.constant 0 : i32
    %c0_i32_0 = arith.constant 0 : i32
    return %c0_i32, %arg0 : i32, i32
  }
  func.func @transform_1(%arg0: i32) -> (i32, i32) {
    %c0_i32 = arith.constant 0 : i32
    %c0_i32_0 = arith.constant 0 : i32
    %c0_i32_1 = arith.constant 0 : i32
    return %c0_i32, %c0_i32_0 : i32, i32
  }
  func.func @transform_2(%arg0: i32) -> (i32, i32) {
    %c0_i32 = arith.constant 0 : i32
    %c0_i32_0 = arith.constant 0 : i32
    %c0_i32_1 = arith.constant 0 : i32
    return %c0_i32, %c0_i32_0 : i32, i32
  }
  func.func @transform_3(%arg0: i32) -> (i32, i32) {
    %c0_i32 = arith.constant 0 : i32
    %c0_i32_0 = arith.constant 0 : i32
    %c0_i32_1 = arith.constant 0 : i32
    return %c0_i32, %c0_i32_0 : i32, i32
  }
  func.func @transform_4(%arg0: i32) -> (i32, i32) {
    %c0_i32 = arith.constant 0 : i32
    %c0_i32_0 = arith.constant 0 : i32
    %c0_i32_1 = arith.constant 0 : i32
    return %c0_i32, %c0_i32_0 : i32, i32
  }
  func.func @transform_5(%arg0: i32) -> (i32, i32) {
    %c0_i32 = arith.constant 0 : i32
    %c0_i32_0 = arith.constant 0 : i32
    %c0_i32_1 = arith.constant 0 : i32
    return %c0_i32, %c0_i32_0 : i32, i32
  }
  func.func @transform_6(%arg0: i32) -> (i32, i32) {
    %c0_i32 = arith.constant 0 : i32
    %c0_i32_0 = arith.constant 0 : i32
    %c0_i32_1 = arith.constant 0 : i32
    return %c0_i32, %c0_i32_0 : i32, i32
  }
  func.func @transform_7(%arg0: i32) -> (i32, i32) {
    %c0_i32 = arith.constant 0 : i32
    %c0_i32_0 = arith.constant 0 : i32
    %c0_i32_1 = arith.constant 0 : i32
    return %c0_i32, %c0_i32_0 : i32, i32
  }
  func.func @transform_8(%arg0: i32) -> (i32, i32) {
    %c0_i32 = arith.constant 0 : i32
    %c0_i32_0 = arith.constant 0 : i32
    %c0_i32_1 = arith.constant 0 : i32
    return %c0_i32, %c0_i32_0 : i32, i32
  }
  func.func @transform_9(%arg0: i32) -> (i32, i32) {
    %c0_i32 = arith.constant 0 : i32
    %c0_i32_0 = arith.constant 0 : i32
    return %c0_i32, %arg0 : i32, i32
  }
}

</mosaic_0001>

<bundles_post_ra>
// kernel: tpu_custom_call.1
= control target key start
LH: loop header
LB: loop body
LE: loop exit
PB: predicated region body
PF: predicated region fallthrough
CT: control target
= control target key end

     0   :  { %vm225_vm0 = vcmask 1042432   ;;  %v1768_v0 = vmov 0   ;;  %vm1769_vm1 = vmmov 1   ;;  %v1770_v5 = vmov 0.0|0.0   ;;  %s2606_s2 = inlined_call_operand.vmem [shape: f32[150,1], index: 2, kind: input, shape index: {}]   ;;  %s2607_s0 = inlined_call_operand.vmem [shape: f32[11,12], index: 0, kind: input, shape index: {}]   ;;  %s2608_s1 = inlined_call_operand.vmem [shape: f32[150,11], index: 1, kind: input, shape index: {}]   ;;  %s2609_s4 = inlined_call_operand.vmem [shape: f32[150,1], index: 4, kind: input, shape index: {}]   ;;  %s2610_s6 = inlined_call_operand.vmem [shape: f32[150,1], index: 6, kind: input, shape index: {}]   ;;  %s2611_s8 = inlined_call_operand.vmem [shape: f32[100,1], index: 8, kind: input, shape index: {}]   ;;  %s2612_s3 = inlined_call_operand.vmem [shape: f32[150,150], index: 3, kind: input, shape index: {}]   ;;  %s2613_s5 = inlined_call_operand.vmem [shape: f32[150,150], index: 5, kind: input, shape index: {}]   ;;  %s2614_s7 = inlined_call_operand.vmem [shape: f32[100,150], index: 7, kind: input, shape index: {}]   ;;  %s2615_s9 = inlined_call_operand.vmem [shape: f32[100,12], index: 9, kind: output, shape index: {}]  }
   0x1   :  { %1767 = vset.pattern.permute.xlu1 %v1768_v0  ;;  %1766 = vset.pattern.permute.xlu0 %v1768_v0  ;;  %v55_v1 = vld [vmem:[%s2606_s2 + $0x10] sm:$0xff]  ;;  %v53_v2 = vld [vmem:[%s2606_s2] sm:$0xff]  ;;  %v33_v4 = vld [vmem:[%s2607_s0 + $0x8] sm:$0x7]  ;;  %vm1771_vm3 = vmmov 0   ;;  %v1772_v7 = vmov 0.0  }
   0x2   :  { %v32_v3 = vld [vmem:[%s2607_s0] sm:$0xff]  ;;  %84 = vperm.xlu1 %1767, %v55_v1   ;;  %74 = vperm.xlu0 %1766, %v53_v2   ;;  %vm1658_vm2 = vmpackc.low %vm225_vm0, %vm1769_vm1  ;;  %v56_v8 = vld [vmem:[%s2606_s2 + $0x18] sm:$0xff]  ;;  %vm167_vm4 = vcmask 89088   ;;  %vm560_vm5 = vcmask 179200   ;;  %vm618_vm6 = vcmask 1045504   ;;  %vm1481_vm7 = vcmask 97280  }
   0x3   :  { %1656 = vmatprep.subr.bf16.mxu0 %v1770_v5  ;;  %v1657_v6 = vpack.c.bf16 %v33_v4, %v32_v3  ;;  %1599 = vmatprep.mubr.msk.f32.mxu0 %vm1771_vm3, %v1772_v7  ;;  %v54_v9 = vld [vmem:[%s2606_s2 + $0x8] sm:$0xff]  ;;  %v34_v10 = vld [vmem:[%s2608_s1] sm:$0xff]  ;;  %v60_v14 = vld [vmem:[%s2606_s2 + $0x38] sm:$0xff]  ;;  %vm1494_vm8 = vcmask 93184  }
   0x4   :  { %1660 = vmatprep.subr.bf16.mxu1 %v1770_v5  ;;  %v58_v11 = vld [vmem:[%s2606_s2 + $0x28] sm:$0xff]  ;;  %v57_v12 = vld [vmem:[%s2606_s2 + $0x20] sm:$0xff]  ;;  %v59_v15 = vld [vmem:[%s2606_s2 + $0x30] sm:$0xff] }
   0x5   :  { %1659 = vmatpush3.bf16.msk.msra.mxu0 %vm1658_vm2, %v1657_v6  ;;  %v35_v13 = vld [vmem:[%s2608_s1 + $0x8] sm:$0xff]  ;;  %v36_v16 = vld [vmem:[%s2608_s1 + $0x10] sm:$0xff]  ;;  %v61_v18 = vld [vmem:[%s2606_s2 + $0x40] sm:$0xff] }
   0x6   :  { %89 = vperm.xlu1 %1767, %v56_v8   ;;  %79 = vperm.xlu0 %1766, %v54_v9   ;;  %v62_v17 = vld [vmem:[%s2606_s2 + $0x48] sm:$0xff]  ;;  %v37_v19 = vld [vmem:[%s2608_s1 + $0x18] sm:$0xff]  ;;  %v63_v21 = vld [vmem:[%s2606_s2 + $0x50] sm:$0xff] }
   0x7   :  { %1687 = vmatprep.subr.bf16.mxu0 %v1770_v5  ;;  %v64_v20 = vld [vmem:[%s2606_s2 + $0x58] sm:$0xff]  ;;  %v38_v22 = vld [vmem:[%s2608_s1 + $0x20] sm:$0xff]  ;;  %v66_v23 = vld [vmem:[%s2606_s2 + $0x68] sm:$0xff] }
   0x8   :  { %1600 = vmatmul.mubr.msk.f32.vlgmr.msra.gmra.mrb[0].mxu0 %vm167_vm4, %v34_v10  ;;  %v65_v24 = vld [vmem:[%s2606_s2 + $0x60] sm:$0xff]  ;;  %v39_v25 = vld [vmem:[%s2608_s1 + $0x28] sm:$0xff]  ;;  %v68_v26 = vld [vmem:[%s2606_s2 + $0x78] sm:$0xff] }
   0x9   :  { %1602 = vmatprep.mubr.msk.f32.mxu0 %vm1771_vm3, %v1772_v7  ;;  %v67_v27 = vld [vmem:[%s2606_s2 + $0x70] sm:$0xff]  ;;  %v70_v29 = vld [vmem:[%s2606_s2 + $0x88] sm:$0xff]  ;;  %v69_v30 = vld [vmem:[%s2606_s2 + $0x80] sm:$0xff] }
   0xa   :  { %99 = vperm.xlu1 %1767, %v58_v11   ;;  %94 = vperm.xlu0 %1766, %v57_v12   ;;  %v40_v28 = vld [vmem:[%s2608_s1 + $0x30] sm:$0xff]  ;;  %v41_v31 = vld [vmem:[%s2608_s1 + $0x38] sm:$0xff]  ;;  %v446_v32 = vld [vmem:[%s2609_s4] sm:$0xff] }
   0xb   :  { %v71_v33 = vld [vmem:[%s2606_s2 + $0x90] sm:$0x3f]  ;;  %v42_v34 = vld [vmem:[%s2608_s1 + $0x40] sm:$0xff]  ;;  %v447_v36 = vld [vmem:[%s2609_s4 + $0x8] sm:$0xff] }
   0xc   :  { %1603 = vmatmul.mubr.msk.f32.gmra.mrb[2].mxu0 %vm167_vm4, %v35_v13  ;;  %v448_v35 = vld [vmem:[%s2609_s4 + $0x10] sm:$0xff]  ;;  %v43_v37 = vld [vmem:[%s2608_s1 + $0x48] sm:$0xff]  ;;  %v450_v38 = vld [vmem:[%s2609_s4 + $0x20] sm:$0xff] }
   0xd   :  { %1605 = vmatprep.mubr.msk.f32.mxu0 %vm1771_vm3, %v1772_v7  ;;  %v449_v39 = vld [vmem:[%s2609_s4 + $0x18] sm:$0xff]  ;;  %v44_v40 = vld [vmem:[%s2608_s1 + $0x50] sm:$0xff]  ;;  %v451_v42 = vld [vmem:[%s2609_s4 + $0x28] sm:$0xff] }
   0xe   :  { %109 = vperm.xlu1 %1767, %v60_v14   ;;  %104 = vperm.xlu0 %1766, %v59_v15   ;;  %v452_v41 = vld [vmem:[%s2609_s4 + $0x30] sm:$0xff]  ;;  %v45_v43 = vld [vmem:[%s2608_s1 + $0x58] sm:$0xff]  ;;  %v454_v44 = vld [vmem:[%s2609_s4 + $0x40] sm:$0xff] }
   0xf   :  { %v453_v45 = vld [vmem:[%s2609_s4 + $0x38] sm:$0xff]  ;;  %v46_v46 = vld [vmem:[%s2608_s1 + $0x60] sm:$0xff]  ;;  %v456_v47 = vld [vmem:[%s2609_s4 + $0x50] sm:$0xff] }
  0x10   :  { %1606 = vmatmul.mubr.msk.f32.gmra.mrb[4].mxu0 %vm167_vm4, %v36_v16  ;;  %v455_v48 = vld [vmem:[%s2609_s4 + $0x48] sm:$0xff]  ;;  %v458_v50 = vld [vmem:[%s2609_s4 + $0x60] sm:$0xff]  ;;  %v457_v51 = vld [vmem:[%s2609_s4 + $0x58] sm:$0xff] }
  0x11   :  { %1608 = vmatprep.mubr.msk.f32.mxu0 %vm1771_vm3, %v1772_v7  ;;  %v47_v49 = vld [vmem:[%s2608_s1 + $0x68] sm:$0xff]  ;;  %v48_v52 = vld [vmem:[%s2608_s1 + $0x70] sm:$0xff]  ;;  %v49_v55 = vld [vmem:[%s2608_s1 + $0x78] sm:$0xff] }
  0x12   :  { %119 = vperm.xlu1 %1767, %v62_v17   ;;  %114 = vperm.xlu0 %1766, %v61_v18   ;;  %v460_v53 = vld [vmem:[%s2609_s4 + $0x70] sm:$0xff]  ;;  %v459_v54 = vld [vmem:[%s2609_s4 + $0x68] sm:$0xff]  ;;  %v462_v56 = vld [vmem:[%s2609_s4 + $0x80] sm:$0xff] }
  0x13   :  { %v461_v57 = vld [vmem:[%s2609_s4 + $0x78] sm:$0xff]  ;;  %v50_v58 = vld [vmem:[%s2608_s1 + $0x80] sm:$0xff]  ;;  %v464_v59 = vld [vmem:[%s2609_s4 + $0x90] sm:$0x3f] }
  0x14   :  { %1609 = vmatmul.mubr.msk.f32.gmra.mrb[6].mxu0 %vm167_vm4, %v37_v19  ;;  %v463_v60 = vld [vmem:[%s2609_s4 + $0x88] sm:$0xff]  ;;  %v839_v63 = vld [vmem:[%s2610_s6] sm:$0xff]  ;;  %v52_v0 = vld [vmem:[%s2608_s1 + $0x90] sm:$0x3f] }
  0x15   :  { %1611 = vmatprep.mubr.msk.f32.mxu0 %vm1771_vm3, %v1772_v7  ;;  %v51_v61 = vld [vmem:[%s2608_s1 + $0x88] sm:$0xff]  ;;  %v842_v1 = vld [vmem:[%s2610_s6 + $0x18] sm:$0xff]  ;;  %v841_v2 = vld [vmem:[%s2610_s6 + $0x10] sm:$0xff] }
  0x16   :  { %129 = vperm.xlu1 %1767, %v64_v20   ;;  %124 = vperm.xlu0 %1766, %v63_v21   ;;  %v840_v62 = vld [vmem:[%s2610_s6 + $0x8] sm:$0xff]  ;;  %v843_v4 = vld [vmem:[%s2610_s6 + $0x20] sm:$0xff]  ;;  %v846_v6 = vld [vmem:[%s2610_s6 + $0x38] sm:$0xff] }
  0x17   :  { %v844_v3 = vld [vmem:[%s2610_s6 + $0x28] sm:$0xff]  ;;  %v845_v8 = vld [vmem:[%s2610_s6 + $0x30] sm:$0xff]  ;;  %v847_v10 = vld [vmem:[%s2610_s6 + $0x40] sm:$0xff] }
  0x18   :  { %1612 = vmatmul.mubr.msk.f32.gmra.mrb[8].mxu0 %vm167_vm4, %v38_v22  ;;  %v848_v9 = vld [vmem:[%s2610_s6 + $0x48] sm:$0xff]  ;;  %v850_v11 = vld [vmem:[%s2610_s6 + $0x58] sm:$0xff]  ;;  %v849_v12 = vld [vmem:[%s2610_s6 + $0x50] sm:$0xff] }
  0x19   :  { %1614 = vmatprep.mubr.msk.f32.mxu0 %vm1771_vm3, %v1772_v7  ;;  %v852_v13 = vld [vmem:[%s2610_s6 + $0x68] sm:$0xff]  ;;  %v851_v14 = vld [vmem:[%s2610_s6 + $0x60] sm:$0xff]  ;;  %v854_v15 = vld [vmem:[%s2610_s6 + $0x78] sm:$0xff] }
  0x1a   :  { %139 = vperm.xlu1 %1767, %v66_v23   ;;  %134 = vperm.xlu0 %1766, %v65_v24   ;;  %v853_v16 = vld [vmem:[%s2610_s6 + $0x70] sm:$0xff]  ;;  %v856_v17 = vld [vmem:[%s2610_s6 + $0x88] sm:$0xff]  ;;  %v855_v18 = vld [vmem:[%s2610_s6 + $0x80] sm:$0xff] }
  0x1b   :  { %v1218_v19 = vld [vmem:[%s2611_s8] sm:$0xff]  ;;  %v857_v20 = vld [vmem:[%s2610_s6 + $0x90] sm:$0x3f]  ;;  %v1219_v22 = vld [vmem:[%s2611_s8 + $0x8] sm:$0xff] }
  0x1c   :  { %1615 = vmatmul.mubr.msk.f32.gmra.mrb[10].mxu0 %vm167_vm4, %v39_v25  ;;  %v1220_v21 = vld [vmem:[%s2611_s8 + $0x10] sm:$0xff]  ;;  %v1222_v23 = vld [vmem:[%s2611_s8 + $0x20] sm:$0xff]  ;;  %v1221_v24 = vld [vmem:[%s2611_s8 + $0x18] sm:$0xff] }
  0x1d   :  { %1617 = vmatprep.mubr.msk.f32.mxu0 %vm1771_vm3, %v1772_v7  ;;  %v1224_v25 = vld [vmem:[%s2611_s8 + $0x30] sm:$0xff] }
  0x1e   :  { %149 = vperm.xlu1 %1767, %v68_v26   ;;  %144 = vperm.xlu0 %1766, %v67_v27   ;;  %v1223_v26 = vld [vmem:[%s2611_s8 + $0x28] sm:$0xff]  ;;  %v1226_v27 = vld [vmem:[%s2611_s8 + $0x40] sm:$0xff] }
  0x20   :  { %1618 = vmatmul.mubr.msk.f32.gmra.mrb[12].mxu0 %vm167_vm4, %v40_v28  ;;  %v1225_v28 = vld [vmem:[%s2611_s8 + $0x38] sm:$0xff] }
  0x21   :  { %1620 = vmatprep.mubr.msk.f32.mxu0 %vm1771_vm3, %v1772_v7 }
  0x22   :  { %159 = vperm.xlu1 %1767, %v70_v29   ;;  %154 = vperm.xlu0 %1766, %v69_v30   ;;  %v1228_v29 = vld [vmem:[%s2611_s8 + $0x50] sm:$0xff]  ;;  %v1227_v30 = vld [vmem:[%s2611_s8 + $0x48] sm:$0xff] }
  0x24   :  { %1621 = vmatmul.mubr.msk.f32.gmra.mrb[14].mxu0 %vm167_vm4, %v41_v31  ;;  %v1230_v31 = vld [vmem:[%s2611_s8 + $0x60] sm:$0xf] }
  0x25   :  { %1623 = vmatprep.mubr.msk.f32.mxu0 %vm1771_vm3, %v1772_v7 }
  0x26   :  { %467 = vperm.xlu1 %1767, %v446_v32   ;;  %164 = vperm.xlu0 %1766, %v71_v33   ;;  %v1229_v32 = vld [vmem:[%s2611_s8 + $0x58] sm:$0xff]  ;;  %v409_v33 = vld [vmem:[%s2612_s3 + $0x8] sm:$0xff] }
  0x27   :  { %1521 = vmatprep.mubr.msk.f32.mxu1 %vm560_vm5, %v409_v33 }
  0x28   :  { %1624 = vmatmul.mubr.msk.f32.gmra.mrb[16].mxu0 %vm167_vm4, %v42_v34 }
  0x29   :  { %1626 = vmatprep.mubr.msk.f32.mxu0 %vm1771_vm3, %v1772_v7 }
  0x2a   :  { %477 = vperm.xlu1 %1767, %v448_v35   ;;  %472 = vperm.xlu0 %1766, %v447_v36  }
  0x2c   :  { %1627 = vmatmul.mubr.msk.f32.gmra.mrb[18].mxu0 %vm167_vm4, %v43_v37 }
  0x2d   :  { %1629 = vmatprep.mubr.msk.f32.mxu0 %vm1771_vm3, %v1772_v7 }
  0x2e   :  { %487 = vperm.xlu1 %1767, %v450_v38   ;;  %482 = vperm.xlu0 %1766, %v449_v39  }
  0x30   :  { %1630 = vmatmul.mubr.msk.f32.gmra.mrb[20].mxu0 %vm167_vm4, %v44_v40 }
  0x31   :  { %1632 = vmatprep.mubr.msk.f32.mxu0 %vm1771_vm3, %v1772_v7 }
  0x32   :  { %497 = vperm.xlu1 %1767, %v452_v41   ;;  %492 = vperm.xlu0 %1766, %v451_v42  }
  0x34   :  { %1633 = vmatmul.mubr.msk.f32.gmra.mrb[22].mxu0 %vm167_vm4, %v45_v43 }
  0x35   :  { %1635 = vmatprep.mubr.msk.f32.mxu0 %vm1771_vm3, %v1772_v7 }
  0x36   :  { %507 = vperm.xlu1 %1767, %v454_v44   ;;  %502 = vperm.xlu0 %1766, %v453_v45  }
  0x38   :  { %1636 = vmatmul.mubr.msk.f32.gmra.mrb[24].mxu0 %vm167_vm4, %v46_v46 }
  0x39   :  { %1638 = vmatprep.mubr.msk.f32.mxu0 %vm1771_vm3, %v1772_v7 }
  0x3a   :  { %517 = vperm.xlu1 %1767, %v456_v47   ;;  %512 = vperm.xlu0 %1766, %v455_v48  }
  0x3c   :  { %1639 = vmatmul.mubr.msk.f32.gmra.mrb[26].mxu0 %vm167_vm4, %v47_v49 }
  0x3d   :  { %1641 = vmatprep.mubr.msk.f32.mxu0 %vm1771_vm3, %v1772_v7 }
  0x3e   :  { %527 = vperm.xlu1 %1767, %v458_v50   ;;  %522 = vperm.xlu0 %1766, %v457_v51  }
  0x40   :  { %1642 = vmatmul.mubr.msk.f32.gmra.mrb[28].mxu0 %vm167_vm4, %v48_v52 }
  0x41   :  { %1644 = vmatprep.mubr.msk.f32.mxu0 %vm1771_vm3, %v1772_v7 }
  0x42   :  { %537 = vperm.xlu1 %1767, %v460_v53   ;;  %532 = vperm.xlu0 %1766, %v459_v54  }
  0x44   :  { %1645 = vmatmul.mubr.msk.f32.gmra.mrb[30].mxu0 %vm167_vm4, %v49_v55 }
  0x45   :  { %1647 = vmatprep.mubr.msk.f32.mxu0 %vm1771_vm3, %v1772_v7 }
  0x46   :  { %547 = vperm.xlu1 %1767, %v462_v56   ;;  %542 = vperm.xlu0 %1766, %v461_v57  }
  0x48   :  { %1648 = vmatmul.mubr.msk.f32.gmra.mrb[32].mxu0 %vm167_vm4, %v50_v58 }
  0x49   :  { %1650 = vmatprep.mubr.msk.f32.mxu0 %vm1771_vm3, %v1772_v7 }
  0x4a   :  { %557 = vperm.xlu1 %1767, %v464_v59   ;;  %552 = vperm.xlu0 %1766, %v463_v60  }
  0x4c   :  { %1651 = vmatmul.mubr.msk.f32.gmra.mrb[34].mxu0 %vm167_vm4, %v51_v61 }
  0x4d   :  { %1653 = vmatprep.mubr.msk.f32.mxu0 %vm1771_vm3, %v1772_v7 }
  0x4e   :  { %865 = vperm.xlu1 %1767, %v840_v62   ;;  %860 = vperm.xlu0 %1766, %v839_v63  }
  0x50   :  { %1654 = vmatmul.mubr.msk.f32.gmra.mrb[36].mxu0 %vm167_vm4, %v52_v0 }
  0x52   :  { %875 = vperm.xlu1 %1767, %v842_v1   ;;  %870 = vperm.xlu0 %1766, %v841_v2  }
  0x56   :  { %885 = vperm.xlu1 %1767, %v844_v3   ;;  %880 = vperm.xlu0 %1766, %v843_v4  }
  0x5a   :  { %895 = vperm.xlu1 %1767, %v846_v6   ;;  %890 = vperm.xlu0 %1766, %v845_v8  }
  0x5e   :  { %905 = vperm.xlu1 %1767, %v848_v9   ;;  %900 = vperm.xlu0 %1766, %v847_v10  }
  0x62   :  { %915 = vperm.xlu1 %1767, %v850_v11   ;;  %910 = vperm.xlu0 %1766, %v849_v12  }
  0x66   :  { %925 = vperm.xlu1 %1767, %v852_v13   ;;  %920 = vperm.xlu0 %1766, %v851_v14  }
  0x6a   :  { %935 = vperm.xlu1 %1767, %v854_v15   ;;  %930 = vperm.xlu0 %1766, %v853_v16  }
  0x6e   :  { %945 = vperm.xlu1 %1767, %v856_v17   ;;  %940 = vperm.xlu0 %1766, %v855_v18  }
  0x72   :  { %1233 = vperm.xlu1 %1767, %v1218_v19   ;;  %950 = vperm.xlu0 %1766, %v857_v20  }
  0x76   :  { %1243 = vperm.xlu1 %1767, %v1220_v21   ;;  %1238 = vperm.xlu0 %1766, %v1219_v22  }
  0x7a   :  { %1253 = vperm.xlu1 %1767, %v1222_v23   ;;  %1248 = vperm.xlu0 %1766, %v1221_v24  }
  0x7e   :  { %1263 = vperm.xlu1 %1767, %v1224_v25   ;;  %1258 = vperm.xlu0 %1766, %v1223_v26  }
  0x81   :  { %v75_v34 = vpop.permute.xlu0 %74  ;;  %v85_v42 = vpop.permute.xlu1 %84 }
  0x82   :  { %1273 = vperm.xlu1 %1767, %v1226_v27   ;;  %1268 = vperm.xlu0 %1766, %v1225_v28  }
  0x85   :  { %v80_v38 = vpop.permute.xlu0 %79  ;;  %v90_v49 = vpop.permute.xlu1 %89 }
  0x86   :  { %1283 = vperm.xlu1 %1767, %v1228_v29   ;;  %1278 = vperm.xlu0 %1766, %v1227_v30  }
  0x89   :  { %v95_v58 = vpop.permute.xlu0 %94  ;;  %v100_v60 = vpop.permute.xlu1 %99 }
  0x8a   :  { %1293 = vperm.xlu1 %1767, %v1230_v31   ;;  %1288 = vperm.xlu0 %1766, %v1229_v32  }
  0x8d   :  { %v105_v6 = vpop.permute.xlu0 %104  ;;  %v110_v9 = vpop.permute.xlu1 %109 }
  0x91   :  { %v115_v18 = vpop.permute.xlu0 %114  ;;  %v120_v20 = vpop.permute.xlu1 %119 }
  0x95   :  { %v125_v29 = vpop.permute.xlu0 %124  ;;  %v130_v31 = vpop.permute.xlu1 %129 }
  0xdb   :  { %v295_v35 = vpop.f32.mrb[0].mxu0 }
  0xdc   :  { %v1601_v36 = vpop.f32.mrb[1].mxu0  ;;  %v296_v37 = vadd.f32 %v295_v35, %v75_v34 }
  0xde   :  { %v389_v43 = vmax.f32 %v296_v37, 0.0 }
  0xdf   :  { %v300_v39 = vpop.f32.mrb[2].mxu0 }
  0xe0   :  { %v301_v40 = vadd.f32 %v300_v39, %v80_v38  ;;  %v1604_v41 = vpop.f32.mrb[3].mxu0 }
  0xe2   :  { %v390_v44 = vmax.f32 %v301_v40, 0.0  ;;  %v135_v40 = vpop.permute.xlu0 %134 }
  0xe3   :  { %v305_v45 = vpop.f32.mrb[4].mxu0 }
  0xe4   :  { %v1607_v46 = vpop.f32.mrb[5].mxu0  ;;  %v1661_v47 = vpack.c.bf16 %v390_v44, %v389_v43  ;;  %v306_v48 = vadd.f32 %v305_v45, %v85_v42  ;;  %v140_v42 = vpop.permute.xlu1 %139 }
  0xe6   :  { %1662 = vmatpush1.bf16.msra.mxu1 %v1661_v47  ;;  %v391_v53 = vmax.f32 %v306_v48, 0.0 }
  0xe7   :  { %v310_v50 = vpop.f32.mrb[6].mxu0  ;;  %1663 = vmatprep.subr.bf16.mxu1 %v1770_v5 }
  0xe8   :  { %v311_v51 = vadd.f32 %v310_v50, %v90_v49  ;;  %v1610_v52 = vpop.f32.mrb[7].mxu0 }
  0xea   :  { %v392_v54 = vmax.f32 %v311_v51, 0.0  ;;  %v145_v51 = vpop.permute.xlu0 %144 }
  0xeb   :  { %v315_v55 = vpop.f32.mrb[8].mxu0 }
  0xec   :  { %v1664_v56 = vpack.c.bf16 %v392_v54, %v391_v53  ;;  %v1613_v57 = vpop.f32.mrb[9].mxu0  ;;  %v316_v59 = vadd.f32 %v315_v55, %v95_v58  ;;  %v150_v53 = vpop.permute.xlu1 %149 }
  0xee   :  { %1665 = vmatpush1.bf16.msra.mxu1 %v1664_v56  ;;  %v393_v0 = vmax.f32 %v316_v59, 0.0 }
  0xef   :  { %v320_v61 = vpop.f32.mrb[10].mxu0  ;;  %1666 = vmatprep.subr.bf16.mxu1 %v1770_v5 }
  0xf0   :  { %v321_v62 = vadd.f32 %v320_v61, %v100_v60  ;;  %v1616_v63 = vpop.f32.mrb[11].mxu0 }
  0xf2   :  { %v394_v1 = vmax.f32 %v321_v62, 0.0  ;;  %v155_v62 = vpop.permute.xlu0 %154 }
  0xf3   :  { %v325_v2 = vpop.f32.mrb[12].mxu0 }
  0xf4   :  { %v1667_v3 = vpack.c.bf16 %v394_v1, %v393_v0  ;;  %v1619_v4 = vpop.f32.mrb[13].mxu0  ;;  %v326_v8 = vadd.f32 %v325_v2, %v105_v6  ;;  %v160_v0 = vpop.permute.xlu1 %159 }
  0xf6   :  { %1668 = vmatpush1.bf16.msra.mxu1 %v1667_v3  ;;  %v395_v13 = vmax.f32 %v326_v8, 0.0  ;;  %v165_v8 = vpop.permute.xlu0 %164 }
  0xf7   :  { %v330_v10 = vpop.f32.mrb[14].mxu0  ;;  %1669 = vmatprep.subr.bf16.mxu1 %v1770_v5 }
  0xf8   :  { %v331_v11 = vadd.f32 %v330_v10, %v110_v9  ;;  %v1622_v12 = vpop.f32.mrb[15].mxu0 }
  0xfa   :  { %v396_v14 = vmax.f32 %v331_v11, 0.0 }
  0xfb   :  { %v335_v15 = vpop.f32.mrb[16].mxu0 }
  0xfc   :  { %v1670_v16 = vpack.c.bf16 %v396_v14, %v395_v13  ;;  %v1625_v17 = vpop.f32.mrb[17].mxu0  ;;  %v336_v19 = vadd.f32 %v335_v15, %v115_v18  ;;  %v408_v14 = vld [vmem:[%s2612_s3] sm:$0xff]  ;;  %v411_v15 = vld [vmem:[%s2612_s3 + $0x18] sm:$0xff] }
  0xfd   :  { %v413_v17 = vld [vmem:[%s2612_s3 + $0x28] sm:$0xff]  ;;  %v412_v18 = vld [vmem:[%s2612_s3 + $0x20] sm:$0xff] }
  0xfe   :  { %1671 = vmatpush1.bf16.msra.mxu1 %v1670_v16  ;;  %v397_v24 = vmax.f32 %v336_v19, 0.0  ;;  %v410_v16 = vld [vmem:[%s2612_s3 + $0x10] sm:$0xff]  ;;  %v415_v19 = vld [vmem:[%s2612_s3 + $0x38] sm:$0xff] }
  0xff   :  { %v340_v21 = vpop.f32.mrb[18].mxu0  ;;  %1672 = vmatprep.subr.bf16.mxu1 %v1770_v5 }
 0x100   :  { %v341_v22 = vadd.f32 %v340_v21, %v120_v20  ;;  %v1628_v23 = vpop.f32.mrb[19].mxu0  ;;  %v414_v20 = vld [vmem:[%s2612_s3 + $0x30] sm:$0xff]  ;;  %v417_v21 = vld [vmem:[%s2612_s3 + $0x48] sm:$0xff] }
 0x101   :  { %v419_v23 = vld [vmem:[%s2612_s3 + $0x58] sm:$0xff] }
 0x102   :  { %v398_v25 = vmax.f32 %v341_v22, 0.0  ;;  %v416_v22 = vld [vmem:[%s2612_s3 + $0x40] sm:$0xff] }
 0x103   :  { %v345_v26 = vpop.f32.mrb[20].mxu0 }
 0x104   :  { %v1673_v27 = vpack.c.bf16 %v398_v25, %v397_v24  ;;  %v1631_v28 = vpop.f32.mrb[21].mxu0  ;;  %v346_v30 = vadd.f32 %v345_v26, %v125_v29  ;;  %v418_v24 = vld [vmem:[%s2612_s3 + $0x50] sm:$0xff]  ;;  %v421_v25 = vld [vmem:[%s2612_s3 + $0x68] sm:$0xff]  ;;  %v420_v26 = vld [vmem:[%s2612_s3 + $0x60] sm:$0xff] }
 0x105   :  { %v422_v28 = vld [vmem:[%s2612_s3 + $0x70] sm:$0xff]  ;;  %v425_v29 = vld [vmem:[%s2612_s3 + $0x88] sm:$0xff] }
 0x106   :  { %1674 = vmatpush1.bf16.msra.mxu1 %v1673_v27  ;;  %v399_v35 = vmax.f32 %v346_v30, 0.0  ;;  %v423_v27 = vld [vmem:[%s2612_s3 + $0x78] sm:$0xff]  ;;  %v424_v30 = vld [vmem:[%s2612_s3 + $0x80] sm:$0xff] }
 0x107   :  { %v350_v32 = vpop.f32.mrb[22].mxu0  ;;  %1675 = vmatprep.subr.bf16.mxu1 %v1770_v5 }
 0x108   :  { %v351_v33 = vadd.f32 %v350_v32, %v130_v31  ;;  %v1634_v34 = vpop.f32.mrb[23].mxu0  ;;  %v427_v31 = vld [vmem:[%s2612_s3 + $0x98] sm:$0xff]  ;;  %v426_v32 = vld [vmem:[%s2612_s3 + $0x90] sm:$0xff] }
 0x109   :  { %v428_v34 = vld [vmem:[%s2612_s3 + $0xa0] sm:$0xff] }
 0x10a   :  { %v400_v36 = vmax.f32 %v351_v33, 0.0  ;;  %v429_v33 = vld [vmem:[%s2612_s3 + $0xa8] sm:$0xff] }
 0x10b   :  { %v355_v37 = vpop.f32.mrb[24].mxu0 }
 0x10c   :  { %v1676_v38 = vpack.c.bf16 %v400_v36, %v399_v35  ;;  %v1637_v39 = vpop.f32.mrb[25].mxu0  ;;  %v356_v41 = vadd.f32 %v355_v37, %v135_v40  ;;  %v431_v35 = vld [vmem:[%s2612_s3 + $0xb8] sm:$0xff]  ;;  %v430_v36 = vld [vmem:[%s2612_s3 + $0xb0] sm:$0xff]  ;;  %v433_v37 = vld [vmem:[%s2612_s3 + $0xc8] sm:$0xff] }
 0x10d   :  { %v435_v39 = vld [vmem:[%s2612_s3 + $0xd8] sm:$0xff]  ;;  %v434_v40 = vld [vmem:[%s2612_s3 + $0xd0] sm:$0xff] }
 0x10e   :  { %1677 = vmatpush1.bf16.msra.mxu1 %v1676_v38  ;;  %v401_v46 = vmax.f32 %v356_v41, 0.0  ;;  %v432_v38 = vld [vmem:[%s2612_s3 + $0xc0] sm:$0xff]  ;;  %v437_v41 = vld [vmem:[%s2612_s3 + $0xe8] sm:$0xff] }
 0x10f   :  { %v360_v43 = vpop.f32.mrb[26].mxu0  ;;  %1678 = vmatprep.subr.bf16.mxu1 %v1770_v5 }
 0x110   :  { %v361_v44 = vadd.f32 %v360_v43, %v140_v42  ;;  %v1640_v45 = vpop.f32.mrb[27].mxu0  ;;  %v436_v42 = vld [vmem:[%s2612_s3 + $0xe0] sm:$0xff]  ;;  %v439_v43 = vld [vmem:[%s2612_s3 + $0xf8] sm:$0xff] }
 0x111   :  { %v441_v45 = vld [vmem:[%s2612_s3 + $0x108] sm:$0xff] }
 0x112   :  { %v402_v47 = vmax.f32 %v361_v44, 0.0  ;;  %v438_v44 = vld [vmem:[%s2612_s3 + $0xf0] sm:$0xff] }
 0x113   :  { %v365_v48 = vpop.f32.mrb[28].mxu0 }
 0x114   :  { %v1679_v49 = vpack.c.bf16 %v402_v47, %v401_v46  ;;  %v1643_v50 = vpop.f32.mrb[29].mxu0  ;;  %v366_v52 = vadd.f32 %v365_v48, %v145_v51  ;;  %v440_v46 = vld [vmem:[%s2612_s3 + $0x100] sm:$0xff]  ;;  %v443_v47 = vld [vmem:[%s2612_s3 + $0x118] sm:$0xff]  ;;  %v442_v48 = vld [vmem:[%s2612_s3 + $0x110] sm:$0xff] }
 0x115   :  { %v444_v50 = vld [vmem:[%s2612_s3 + $0x120] sm:$0x3f]  ;;  %v802_v51 = vld [vmem:[%s2613_s5 + $0x8] sm:$0xff] }
 0x116   :  { %1680 = vmatpush1.bf16.msra.mxu1 %v1679_v49  ;;  %v403_v57 = vmax.f32 %v366_v52, 0.0  ;;  %v445_v49 = vld [vmem:[%s2612_s3 + $0x128] sm:$0x3f]  ;;  %1541 = vmatprep.mubr.msk.f32.mxu0 %vm560_vm5, %v802_v51 }
 0x117   :  { %v370_v54 = vpop.f32.mrb[30].mxu0  ;;  %1681 = vmatprep.subr.bf16.mxu1 %v1770_v5 }
 0x118   :  { %v371_v55 = vadd.f32 %v370_v54, %v150_v53  ;;  %v1646_v56 = vpop.f32.mrb[31].mxu0  ;;  %v468_v54 = vpop.permute.xlu1 %467 }
 0x119   :  { %v473_v56 = vpop.permute.xlu0 %472 }
 0x11a   :  { %v404_v58 = vmax.f32 %v371_v55, 0.0 }
 0x11b   :  { %v375_v59 = vpop.f32.mrb[32].mxu0 }
 0x11c   :  { %v1682_v60 = vpack.c.bf16 %v404_v58, %v403_v57  ;;  %v1649_v61 = vpop.f32.mrb[33].mxu0  ;;  %v376_v63 = vadd.f32 %v375_v59, %v155_v62 }
 0x11e   :  { %1683 = vmatpush1.bf16.msra.mxu1 %v1682_v60  ;;  %v405_v4 = vmax.f32 %v376_v63, 0.0 }
 0x11f   :  { %v380_v1 = vpop.f32.mrb[34].mxu0  ;;  %1684 = vmatprep.subr.bf16.mxu1 %v1770_v5 }
 0x120   :  { %v381_v2 = vadd.f32 %v380_v1, %v160_v0  ;;  %v1652_v3 = vpop.f32.mrb[35].mxu0  ;;  %v478_v1 = vpop.permute.xlu1 %477 }
 0x121   :  { %v483_v3 = vpop.permute.xlu0 %482 }
 0x122   :  { %v406_v6 = vmax.f32 %v381_v2, 0.0 }
 0x123   :  { %v385_v9 = vpop.f32.mrb[36].mxu0 }
 0x124   :  { %v1685_v10 = vpack.c.bf16 %v406_v6, %v405_v4  ;;  %v386_v11 = vadd.f32 %v385_v9, %v165_v8  ;;  %v1655_v12 = vpop.f32.mrb[37].mxu0 }
 0x126   :  { %1686 = vmatpush1.bf16.msra.mxu1 %v1685_v10  ;;  %v407_v13 = vmax.f32 %v386_v11, 0.0 }
 0x127   :  { %658 = vmatprep.subr.mxu1 %v1772_v7 }
 0x12a   :  { %1520 = vmatpush1.msk.msra.mxu1 %vm618_vm6, %v407_v13 }
 0x12b   :  { %687 = vmatmul.mubr.f32.vlgmr.msra.gmra.mrb[0].mxu1 %v408_v14  ;;  %1741 = vmatprep.subr.bf16.mxu1 %v1770_v5  ;;  %v488_v14 = vpop.permute.xlu1 %487 }
 0x12c   :  { %1522 = vmatprep.mubr.msk.f32.mxu1 %vm560_vm5, %v411_v15 }
 0x12f   :  { %692 = vmatmul.mubr.f32.gmra.mrb[2].mxu1 %v410_v16  ;;  %v493_v16 = vpop.permute.xlu0 %492 }
 0x130   :  { %1523 = vmatprep.mubr.msk.f32.mxu1 %vm560_vm5, %v413_v17 }
 0x133   :  { %697 = vmatmul.mubr.f32.gmra.mrb[4].mxu1 %v412_v18 }
 0x134   :  { %1524 = vmatprep.mubr.msk.f32.mxu1 %vm560_vm5, %v415_v19 }
 0x137   :  { %702 = vmatmul.mubr.f32.gmra.mrb[6].mxu1 %v414_v20 }
 0x138   :  { %1525 = vmatprep.mubr.msk.f32.mxu1 %vm560_vm5, %v417_v21 }
 0x13b   :  { %707 = vmatmul.mubr.f32.gmra.mrb[8].mxu1 %v416_v22 }
 0x13c   :  { %1526 = vmatprep.mubr.msk.f32.mxu1 %vm560_vm5, %v419_v23 }
 0x13f   :  { %712 = vmatmul.mubr.f32.gmra.mrb[10].mxu1 %v418_v24 }
 0x140   :  { %1527 = vmatprep.mubr.msk.f32.mxu1 %vm560_vm5, %v421_v25  ;;  %v498_v25 = vpop.permute.xlu1 %497 }
 0x143   :  { %717 = vmatmul.mubr.f32.gmra.mrb[12].mxu1 %v420_v26 }
 0x144   :  { %1528 = vmatprep.mubr.msk.f32.mxu1 %vm560_vm5, %v423_v27  ;;  %v503_v27 = vpop.permute.xlu0 %502 }
 0x147   :  { %722 = vmatmul.mubr.f32.gmra.mrb[14].mxu1 %v422_v28 }
 0x148   :  { %1529 = vmatprep.mubr.msk.f32.mxu1 %vm560_vm5, %v425_v29 }
 0x14b   :  { %727 = vmatmul.mubr.f32.gmra.mrb[16].mxu1 %v424_v30 }
 0x14c   :  { %1530 = vmatprep.mubr.msk.f32.mxu1 %vm560_vm5, %v427_v31 }
 0x14f   :  { %732 = vmatmul.mubr.f32.gmra.mrb[18].mxu1 %v426_v32 }
 0x150   :  { %1531 = vmatprep.mubr.msk.f32.mxu1 %vm560_vm5, %v429_v33 }
 0x153   :  { %737 = vmatmul.mubr.f32.gmra.mrb[20].mxu1 %v428_v34 }
 0x154   :  { %1532 = vmatprep.mubr.msk.f32.mxu1 %vm560_vm5, %v431_v35 }
 0x157   :  { %742 = vmatmul.mubr.f32.gmra.mrb[22].mxu1 %v430_v36  ;;  %v508_v36 = vpop.permute.xlu1 %507 }
 0x158   :  { %1533 = vmatprep.mubr.msk.f32.mxu1 %vm560_vm5, %v433_v37 }
 0x15b   :  { %747 = vmatmul.mubr.f32.gmra.mrb[24].mxu1 %v432_v38  ;;  %v513_v38 = vpop.permute.xlu0 %512 }
 0x15c   :  { %1534 = vmatprep.mubr.msk.f32.mxu1 %vm560_vm5, %v435_v39 }
 0x15f   :  { %752 = vmatmul.mubr.f32.gmra.mrb[26].mxu1 %v434_v40 }
 0x160   :  { %1535 = vmatprep.mubr.msk.f32.mxu1 %vm560_vm5, %v437_v41 }
 0x163   :  { %757 = vmatmul.mubr.f32.gmra.mrb[28].mxu1 %v436_v42 }
 0x164   :  { %1536 = vmatprep.mubr.msk.f32.mxu1 %vm560_vm5, %v439_v43 }
 0x167   :  { %762 = vmatmul.mubr.f32.gmra.mrb[30].mxu1 %v438_v44 }
 0x168   :  { %1537 = vmatprep.mubr.msk.f32.mxu1 %vm560_vm5, %v441_v45 }
 0x16b   :  { %767 = vmatmul.mubr.f32.gmra.mrb[32].mxu1 %v440_v46 }
 0x16c   :  { %1538 = vmatprep.mubr.msk.f32.mxu1 %vm560_vm5, %v443_v47  ;;  %v518_v47 = vpop.permute.xlu1 %517 }
 0x16f   :  { %772 = vmatmul.mubr.f32.gmra.mrb[34].mxu1 %v442_v48 }
 0x170   :  { %1539 = vmatprep.mubr.msk.f32.mxu1 %vm560_vm5, %v445_v49  ;;  %v523_v49 = vpop.permute.xlu0 %522 }
 0x173   :  { %777 = vmatmul.mubr.f32.gmra.mrb[36].mxu1 %v444_v50 }
 0x1fe   :  { %v688_v52 = vpop.f32.mrb[0].mxu1 }
 0x1ff   :  { %v690_v53 = vpop.f32.mrb[1].mxu1  ;;  %v689_v55 = vadd.f32 %v688_v52, %v468_v54 }
 0x201   :  { %v782_v60 = vmax.f32 %v689_v55, 0.0 }
 0x202   :  { %v693_v57 = vpop.f32.mrb[2].mxu1 }
 0x203   :  { %v694_v58 = vadd.f32 %v693_v57, %v473_v56  ;;  %v695_v59 = vpop.f32.mrb[3].mxu1 }
 0x205   :  { %v783_v61 = vmax.f32 %v694_v58, 0.0  ;;  %v528_v58 = vpop.permute.xlu1 %527 }
 0x206   :  { %v698_v62 = vpop.f32.mrb[4].mxu1 }
 0x207   :  { %v1688_v63 = vpack.c.bf16 %v783_v61, %v782_v60  ;;  %v700_v0 = vpop.f32.mrb[5].mxu1  ;;  %v699_v2 = vadd.f32 %v698_v62, %v478_v1  ;;  %v533_v60 = vpop.permute.xlu0 %532 }
 0x209   :  { %1689 = vmatpush1.bf16.msra.mxu0 %v1688_v63  ;;  %v784_v9 = vmax.f32 %v699_v2, 0.0 }
 0x20a   :  { %v703_v4 = vpop.f32.mrb[6].mxu1  ;;  %1690 = vmatprep.subr.bf16.mxu0 %v1770_v5 }
 0x20b   :  { %v704_v6 = vadd.f32 %v703_v4, %v483_v3  ;;  %v705_v8 = vpop.f32.mrb[7].mxu1 }
 0x20d   :  { %v785_v10 = vmax.f32 %v704_v6, 0.0  ;;  %v538_v6 = vpop.permute.xlu1 %537 }
 0x20e   :  { %v708_v11 = vpop.f32.mrb[8].mxu1 }
 0x20f   :  { %v1691_v12 = vpack.c.bf16 %v785_v10, %v784_v9  ;;  %v710_v13 = vpop.f32.mrb[9].mxu1  ;;  %v709_v15 = vadd.f32 %v708_v11, %v488_v14  ;;  %v543_v9 = vpop.permute.xlu0 %542 }
 0x211   :  { %1692 = vmatpush1.bf16.msra.mxu0 %v1691_v12  ;;  %v786_v20 = vmax.f32 %v709_v15, 0.0 }
 0x212   :  { %v713_v17 = vpop.f32.mrb[10].mxu1  ;;  %1693 = vmatprep.subr.bf16.mxu0 %v1770_v5 }
 0x213   :  { %v714_v18 = vadd.f32 %v713_v17, %v493_v16  ;;  %v715_v19 = vpop.f32.mrb[11].mxu1 }
 0x215   :  { %v787_v21 = vmax.f32 %v714_v18, 0.0  ;;  %v548_v18 = vpop.permute.xlu1 %547 }
 0x216   :  { %v718_v22 = vpop.f32.mrb[12].mxu1 }
 0x217   :  { %v1694_v23 = vpack.c.bf16 %v787_v21, %v786_v20  ;;  %v720_v24 = vpop.f32.mrb[13].mxu1  ;;  %v719_v26 = vadd.f32 %v718_v22, %v498_v25  ;;  %v553_v20 = vpop.permute.xlu0 %552 }
 0x219   :  { %1695 = vmatpush1.bf16.msra.mxu0 %v1694_v23  ;;  %v788_v31 = vmax.f32 %v719_v26, 0.0  ;;  %v558_v26 = vpop.permute.xlu1 %557 }
 0x21a   :  { %v723_v28 = vpop.f32.mrb[14].mxu1  ;;  %1696 = vmatprep.subr.bf16.mxu0 %v1770_v5 }
 0x21b   :  { %v724_v29 = vadd.f32 %v723_v28, %v503_v27  ;;  %v725_v30 = vpop.f32.mrb[15].mxu1 }
 0x21d   :  { %v789_v32 = vmax.f32 %v724_v29, 0.0 }
 0x21e   :  { %v728_v33 = vpop.f32.mrb[16].mxu1 }
 0x21f   :  { %v1697_v34 = vpack.c.bf16 %v789_v32, %v788_v31  ;;  %v730_v35 = vpop.f32.mrb[17].mxu1  ;;  %v729_v37 = vadd.f32 %v728_v33, %v508_v36  ;;  %v801_v32 = vld [vmem:[%s2613_s5] sm:$0xff]  ;;  %v804_v33 = vld [vmem:[%s2613_s5 + $0x18] sm:$0xff] }
 0x220   :  { %v806_v35 = vld [vmem:[%s2613_s5 + $0x28] sm:$0xff]  ;;  %v805_v36 = vld [vmem:[%s2613_s5 + $0x20] sm:$0xff] }
 0x221   :  { %1698 = vmatpush1.bf16.msra.mxu0 %v1697_v34  ;;  %v790_v42 = vmax.f32 %v729_v37, 0.0  ;;  %v803_v34 = vld [vmem:[%s2613_s5 + $0x10] sm:$0xff]  ;;  %v808_v37 = vld [vmem:[%s2613_s5 + $0x38] sm:$0xff] }
 0x222   :  { %v733_v39 = vpop.f32.mrb[18].mxu1  ;;  %1699 = vmatprep.subr.bf16.mxu0 %v1770_v5 }
 0x223   :  { %v734_v40 = vadd.f32 %v733_v39, %v513_v38  ;;  %v735_v41 = vpop.f32.mrb[19].mxu1  ;;  %v807_v38 = vld [vmem:[%s2613_s5 + $0x30] sm:$0xff]  ;;  %v810_v39 = vld [vmem:[%s2613_s5 + $0x48] sm:$0xff] }
 0x224   :  { %v812_v41 = vld [vmem:[%s2613_s5 + $0x58] sm:$0xff] }
 0x225   :  { %v791_v43 = vmax.f32 %v734_v40, 0.0  ;;  %v809_v40 = vld [vmem:[%s2613_s5 + $0x40] sm:$0xff] }
 0x226   :  { %v738_v44 = vpop.f32.mrb[20].mxu1 }
 0x227   :  { %v1700_v45 = vpack.c.bf16 %v791_v43, %v790_v42  ;;  %v740_v46 = vpop.f32.mrb[21].mxu1  ;;  %v739_v48 = vadd.f32 %v738_v44, %v518_v47  ;;  %v811_v42 = vld [vmem:[%s2613_s5 + $0x50] sm:$0xff]  ;;  %v814_v43 = vld [vmem:[%s2613_s5 + $0x68] sm:$0xff]  ;;  %v813_v44 = vld [vmem:[%s2613_s5 + $0x60] sm:$0xff] }
 0x228   :  { %v815_v46 = vld [vmem:[%s2613_s5 + $0x70] sm:$0xff]  ;;  %v818_v47 = vld [vmem:[%s2613_s5 + $0x88] sm:$0xff] }
 0x229   :  { %1701 = vmatpush1.bf16.msra.mxu0 %v1700_v45  ;;  %v792_v53 = vmax.f32 %v739_v48, 0.0  ;;  %v816_v45 = vld [vmem:[%s2613_s5 + $0x78] sm:$0xff]  ;;  %v817_v48 = vld [vmem:[%s2613_s5 + $0x80] sm:$0xff] }
 0x22a   :  { %v743_v50 = vpop.f32.mrb[22].mxu1  ;;  %1702 = vmatprep.subr.bf16.mxu0 %v1770_v5 }
 0x22b   :  { %v744_v51 = vadd.f32 %v743_v50, %v523_v49  ;;  %v745_v52 = vpop.f32.mrb[23].mxu1  ;;  %v820_v49 = vld [vmem:[%s2613_s5 + $0x98] sm:$0xff]  ;;  %v819_v50 = vld [vmem:[%s2613_s5 + $0x90] sm:$0xff] }
 0x22c   :  { %v821_v52 = vld [vmem:[%s2613_s5 + $0xa0] sm:$0xff] }
 0x22d   :  { %v793_v54 = vmax.f32 %v744_v51, 0.0  ;;  %v822_v51 = vld [vmem:[%s2613_s5 + $0xa8] sm:$0xff] }
 0x22e   :  { %v748_v55 = vpop.f32.mrb[24].mxu1 }
 0x22f   :  { %v1703_v56 = vpack.c.bf16 %v793_v54, %v792_v53  ;;  %v750_v57 = vpop.f32.mrb[25].mxu1  ;;  %v749_v59 = vadd.f32 %v748_v55, %v528_v58  ;;  %v824_v53 = vld [vmem:[%s2613_s5 + $0xb8] sm:$0xff]  ;;  %v823_v54 = vld [vmem:[%s2613_s5 + $0xb0] sm:$0xff]  ;;  %v826_v55 = vld [vmem:[%s2613_s5 + $0xc8] sm:$0xff] }
 0x230   :  { %v828_v57 = vld [vmem:[%s2613_s5 + $0xd8] sm:$0xff]  ;;  %v827_v58 = vld [vmem:[%s2613_s5 + $0xd0] sm:$0xff] }
 0x231   :  { %1704 = vmatpush1.bf16.msra.mxu0 %v1703_v56  ;;  %v794_v0 = vmax.f32 %v749_v59, 0.0  ;;  %v825_v56 = vld [vmem:[%s2613_s5 + $0xc0] sm:$0xff]  ;;  %v830_v59 = vld [vmem:[%s2613_s5 + $0xe8] sm:$0xff] }
 0x232   :  { %v753_v61 = vpop.f32.mrb[26].mxu1  ;;  %1705 = vmatprep.subr.bf16.mxu0 %v1770_v5 }
 0x233   :  { %v754_v62 = vadd.f32 %v753_v61, %v533_v60  ;;  %v755_v63 = vpop.f32.mrb[27].mxu1  ;;  %v829_v60 = vld [vmem:[%s2613_s5 + $0xe0] sm:$0xff]  ;;  %v832_v61 = vld [vmem:[%s2613_s5 + $0xf8] sm:$0xff] }
 0x234   :  { %v834_v63 = vld [vmem:[%s2613_s5 + $0x108] sm:$0xff] }
 0x235   :  { %v795_v1 = vmax.f32 %v754_v62, 0.0  ;;  %v831_v62 = vld [vmem:[%s2613_s5 + $0xf0] sm:$0xff] }
 0x236   :  { %v758_v2 = vpop.f32.mrb[28].mxu1 }
 0x237   :  { %v1706_v3 = vpack.c.bf16 %v795_v1, %v794_v0  ;;  %v760_v4 = vpop.f32.mrb[29].mxu1  ;;  %v759_v8 = vadd.f32 %v758_v2, %v538_v6  ;;  %v833_v0 = vld [vmem:[%s2613_s5 + $0x100] sm:$0xff]  ;;  %v836_v1 = vld [vmem:[%s2613_s5 + $0x118] sm:$0xff]  ;;  %v835_v2 = vld [vmem:[%s2613_s5 + $0x110] sm:$0xff] }
 0x238   :  { %v837_v4 = vld [vmem:[%s2613_s5 + $0x120] sm:$0x3f]  ;;  %v1193_v6 = vld [vmem:[%s2614_s7 + $0x8] sm:$0xff] }
 0x239   :  { %1707 = vmatpush1.bf16.msra.mxu0 %v1706_v3  ;;  %v796_v13 = vmax.f32 %v759_v8, 0.0  ;;  %v838_v3 = vld [vmem:[%s2613_s5 + $0x128] sm:$0x3f]  ;;  %v1195_v8 = vld [vmem:[%s2614_s7 + $0x18] sm:$0xff] }
 0x23a   :  { %v763_v10 = vpop.f32.mrb[30].mxu1  ;;  %1708 = vmatprep.subr.bf16.mxu0 %v1770_v5  ;;  %1562 = vmatprep.mubr.msk.f32.mxu1 %vm560_vm5, %v1195_v8 }
 0x23b   :  { %v764_v11 = vadd.f32 %v763_v10, %v543_v9  ;;  %v765_v12 = vpop.f32.mrb[31].mxu1 }
 0x23d   :  { %v797_v14 = vmax.f32 %v764_v11, 0.0  ;;  %v861_v11 = vpop.permute.xlu0 %860 }
 0x23e   :  { %v768_v15 = vpop.f32.mrb[32].mxu1 }
 0x23f   :  { %v1709_v16 = vpack.c.bf16 %v797_v14, %v796_v13  ;;  %v770_v17 = vpop.f32.mrb[33].mxu1  ;;  %v769_v19 = vadd.f32 %v768_v15, %v548_v18  ;;  %v866_v13 = vpop.permute.xlu1 %865 }
 0x241   :  { %1710 = vmatpush1.bf16.msra.mxu0 %v1709_v16  ;;  %v798_v24 = vmax.f32 %v769_v19, 0.0 }
 0x242   :  { %v773_v21 = vpop.f32.mrb[34].mxu1  ;;  %1711 = vmatprep.subr.bf16.mxu0 %v1770_v5 }
 0x243   :  { %v774_v22 = vadd.f32 %v773_v21, %v553_v20  ;;  %v775_v23 = vpop.f32.mrb[35].mxu1 }
 0x245   :  { %v799_v25 = vmax.f32 %v774_v22, 0.0  ;;  %v871_v22 = vpop.permute.xlu0 %870 }
 0x246   :  { %v778_v27 = vpop.f32.mrb[36].mxu1 }
 0x247   :  { %v1712_v28 = vpack.c.bf16 %v799_v25, %v798_v24  ;;  %v779_v29 = vadd.f32 %v778_v27, %v558_v26  ;;  %v780_v30 = vpop.f32.mrb[37].mxu1  ;;  %v876_v24 = vpop.permute.xlu1 %875 }
 0x249   :  { %1713 = vmatpush1.bf16.msra.mxu0 %v1712_v28  ;;  %v800_v31 = vmax.f32 %v779_v29, 0.0 }
 0x24a   :  { %1049 = vmatprep.subr.mxu0 %v1772_v7 }
 0x24d   :  { %1540 = vmatpush1.msk.msra.mxu0 %vm618_vm6, %v800_v31 }
 0x24e   :  { %1078 = vmatmul.mubr.f32.vlgmr.msra.gmra.mrb[38].mxu0 %v801_v32  ;;  %1714 = vmatprep.subr.bf16.mxu0 %v1770_v5 }
 0x24f   :  { %1542 = vmatprep.mubr.msk.f32.mxu0 %vm560_vm5, %v804_v33  ;;  %v881_v33 = vpop.permute.xlu0 %880 }
 0x252   :  { %1083 = vmatmul.mubr.f32.gmra.mrb[40].mxu0 %v803_v34 }
 0x253   :  { %1543 = vmatprep.mubr.msk.f32.mxu0 %vm560_vm5, %v806_v35  ;;  %v886_v35 = vpop.permute.xlu1 %885 }
 0x256   :  { %1088 = vmatmul.mubr.f32.gmra.mrb[42].mxu0 %v805_v36 }
 0x257   :  { %1544 = vmatprep.mubr.msk.f32.mxu0 %vm560_vm5, %v808_v37 }
 0x25a   :  { %1093 = vmatmul.mubr.f32.gmra.mrb[44].mxu0 %v807_v38 }
 0x25b   :  { %1545 = vmatprep.mubr.msk.f32.mxu0 %vm560_vm5, %v810_v39 }
 0x25e   :  { %1098 = vmatmul.mubr.f32.gmra.mrb[46].mxu0 %v809_v40 }
 0x25f   :  { %1546 = vmatprep.mubr.msk.f32.mxu0 %vm560_vm5, %v812_v41 }
 0x262   :  { %1103 = vmatmul.mubr.f32.gmra.mrb[48].mxu0 %v811_v42 }
 0x263   :  { %1547 = vmatprep.mubr.msk.f32.mxu0 %vm560_vm5, %v814_v43 }
 0x266   :  { %1108 = vmatmul.mubr.f32.gmra.mrb[50].mxu0 %v813_v44  ;;  %v891_v44 = vpop.permute.xlu0 %890 }
 0x267   :  { %1548 = vmatprep.mubr.msk.f32.mxu0 %vm560_vm5, %v816_v45 }
 0x26a   :  { %1113 = vmatmul.mubr.f32.gmra.mrb[52].mxu0 %v815_v46  ;;  %v896_v46 = vpop.permute.xlu1 %895 }
 0x26b   :  { %1549 = vmatprep.mubr.msk.f32.mxu0 %vm560_vm5, %v818_v47 }
 0x26e   :  { %1118 = vmatmul.mubr.f32.gmra.mrb[54].mxu0 %v817_v48 }
 0x26f   :  { %1550 = vmatprep.mubr.msk.f32.mxu0 %vm560_vm5, %v820_v49 }
 0x272   :  { %1123 = vmatmul.mubr.f32.gmra.mrb[56].mxu0 %v819_v50 }
 0x273   :  { %1551 = vmatprep.mubr.msk.f32.mxu0 %vm560_vm5, %v822_v51 }
 0x276   :  { %1128 = vmatmul.mubr.f32.gmra.mrb[58].mxu0 %v821_v52 }
 0x277   :  { %1552 = vmatprep.mubr.msk.f32.mxu0 %vm560_vm5, %v824_v53 }
 0x27a   :  { %1133 = vmatmul.mubr.f32.gmra.mrb[60].mxu0 %v823_v54 }
 0x27b   :  { %1553 = vmatprep.mubr.msk.f32.mxu0 %vm560_vm5, %v826_v55  ;;  %v901_v55 = vpop.permute.xlu0 %900 }
 0x27e   :  { %1138 = vmatmul.mubr.f32.gmra.mrb[62].mxu0 %v825_v56 }
 0x27f   :  { %1554 = vmatprep.mubr.msk.f32.mxu0 %vm560_vm5, %v828_v57  ;;  %v906_v57 = vpop.permute.xlu1 %905 }
 0x282   :  { %1143 = vmatmul.mubr.f32.gmra.mrb[64].mxu0 %v827_v58 }
 0x283   :  { %1555 = vmatprep.mubr.msk.f32.mxu0 %vm560_vm5, %v830_v59 }
 0x286   :  { %1148 = vmatmul.mubr.f32.gmra.mrb[66].mxu0 %v829_v60 }
 0x287   :  { %1556 = vmatprep.mubr.msk.f32.mxu0 %vm560_vm5, %v832_v61 }
 0x28a   :  { %1153 = vmatmul.mubr.f32.gmra.mrb[68].mxu0 %v831_v62 }
 0x28b   :  { %1557 = vmatprep.mubr.msk.f32.mxu0 %vm560_vm5, %v834_v63 }
 0x28e   :  { %1158 = vmatmul.mubr.f32.gmra.mrb[70].mxu0 %v833_v0 }
 0x28f   :  { %1558 = vmatprep.mubr.msk.f32.mxu0 %vm560_vm5, %v836_v1 }
 0x292   :  { %1163 = vmatmul.mubr.f32.gmra.mrb[72].mxu0 %v835_v2  ;;  %v911_v2 = vpop.permute.xlu0 %910 }
 0x293   :  { %1559 = vmatprep.mubr.msk.f32.mxu0 %vm560_vm5, %v838_v3 }
 0x296   :  { %1168 = vmatmul.mubr.f32.gmra.mrb[74].mxu0 %v837_v4  ;;  %v916_v4 = vpop.permute.xlu1 %915 }
 0x297   :  { %1561 = vmatprep.mubr.msk.f32.mxu0 %vm560_vm5, %v1193_v6 }
 0x321   :  { %v1079_v9 = vpop.f32.mrb[38].mxu0 }
 0x322   :  { %v1081_v10 = vpop.f32.mrb[39].mxu0  ;;  %v1080_v12 = vadd.f32 %v1079_v9, %v861_v11 }
 0x324   :  { %v1173_v17 = vmax.f32 %v1080_v12, 0.0 }
 0x325   :  { %v1084_v14 = vpop.f32.mrb[40].mxu0 }
 0x326   :  { %v1085_v15 = vadd.f32 %v1084_v14, %v866_v13  ;;  %v1086_v16 = vpop.f32.mrb[41].mxu0 }
 0x328   :  { %v1174_v18 = vmax.f32 %v1085_v15, 0.0  ;;  %v921_v15 = vpop.permute.xlu0 %920 }
 0x329   :  { %v1089_v19 = vpop.f32.mrb[42].mxu0 }
 0x32a   :  { %v1715_v20 = vpack.c.bf16 %v1174_v18, %v1173_v17  ;;  %v1091_v21 = vpop.f32.mrb[43].mxu0  ;;  %v1090_v23 = vadd.f32 %v1089_v19, %v871_v22  ;;  %v926_v17 = vpop.permute.xlu1 %925 }
 0x32c   :  { %1716 = vmatpush1.bf16.msra.mxu0 %v1715_v20  ;;  %1751 = vmatpush1.bf16.msra.mxu1 %v1715_v20  ;;  %v1175_v28 = vmax.f32 %v1090_v23, 0.0 }
 0x32d   :  { %v1094_v25 = vpop.f32.mrb[44].mxu0  ;;  %1717 = vmatprep.subr.bf16.mxu0 %v1770_v5  ;;  %1742 = vmatprep.subr.bf16.mxu1 %v1770_v5 }
 0x32e   :  { %v1095_v26 = vadd.f32 %v1094_v25, %v876_v24  ;;  %v1096_v27 = vpop.f32.mrb[45].mxu0 }
 0x330   :  { %v1176_v29 = vmax.f32 %v1095_v26, 0.0  ;;  %v931_v26 = vpop.permute.xlu0 %930 }
 0x331   :  { %v1099_v30 = vpop.f32.mrb[46].mxu0 }
 0x332   :  { %v1718_v31 = vpack.c.bf16 %v1176_v29, %v1175_v28  ;;  %v1101_v32 = vpop.f32.mrb[47].mxu0  ;;  %v1100_v34 = vadd.f32 %v1099_v30, %v881_v33  ;;  %v936_v28 = vpop.permute.xlu1 %935 }
 0x334   :  { %1719 = vmatpush1.bf16.msra.mxu0 %v1718_v31  ;;  %1752 = vmatpush1.bf16.msra.mxu1 %v1718_v31  ;;  %v1177_v39 = vmax.f32 %v1100_v34, 0.0 }
 0x335   :  { %v1104_v36 = vpop.f32.mrb[48].mxu0  ;;  %1720 = vmatprep.subr.bf16.mxu0 %v1770_v5  ;;  %1743 = vmatprep.subr.bf16.mxu1 %v1770_v5 }
 0x336   :  { %v1105_v37 = vadd.f32 %v1104_v36, %v886_v35  ;;  %v1106_v38 = vpop.f32.mrb[49].mxu0 }
 0x338   :  { %v1178_v40 = vmax.f32 %v1105_v37, 0.0  ;;  %v941_v37 = vpop.permute.xlu0 %940 }
 0x339   :  { %v1109_v41 = vpop.f32.mrb[50].mxu0 }
 0x33a   :  { %v1721_v42 = vpack.c.bf16 %v1178_v40, %v1177_v39  ;;  %v1111_v43 = vpop.f32.mrb[51].mxu0  ;;  %v1110_v45 = vadd.f32 %v1109_v41, %v891_v44  ;;  %v946_v39 = vpop.permute.xlu1 %945 }
 0x33c   :  { %1722 = vmatpush1.bf16.msra.mxu0 %v1721_v42  ;;  %1753 = vmatpush1.bf16.msra.mxu1 %v1721_v42  ;;  %v1179_v50 = vmax.f32 %v1110_v45, 0.0  ;;  %v951_v45 = vpop.permute.xlu0 %950 }
 0x33d   :  { %v1114_v47 = vpop.f32.mrb[52].mxu0  ;;  %1723 = vmatprep.subr.bf16.mxu0 %v1770_v5  ;;  %1744 = vmatprep.subr.bf16.mxu1 %v1770_v5 }
 0x33e   :  { %v1115_v48 = vadd.f32 %v1114_v47, %v896_v46  ;;  %v1116_v49 = vpop.f32.mrb[53].mxu0 }
 0x340   :  { %v1180_v51 = vmax.f32 %v1115_v48, 0.0 }
 0x341   :  { %v1119_v52 = vpop.f32.mrb[54].mxu0 }
 0x342   :  { %v1724_v53 = vpack.c.bf16 %v1180_v51, %v1179_v50  ;;  %v1121_v54 = vpop.f32.mrb[55].mxu0  ;;  %v1120_v56 = vadd.f32 %v1119_v52, %v901_v55  ;;  %v1194_v51 = vld [vmem:[%s2614_s7 + $0x10] sm:$0xff]  ;;  %v1197_v52 = vld [vmem:[%s2614_s7 + $0x28] sm:$0xff] }
 0x343   :  { %v1198_v54 = vld [vmem:[%s2614_s7 + $0x30] sm:$0xff]  ;;  %v1201_v55 = vld [vmem:[%s2614_s7 + $0x48] sm:$0xff] }
 0x344   :  { %1725 = vmatpush1.bf16.msra.mxu0 %v1724_v53  ;;  %1754 = vmatpush1.bf16.msra.mxu1 %v1724_v53  ;;  %v1181_v61 = vmax.f32 %v1120_v56, 0.0  ;;  %v1199_v53 = vld [vmem:[%s2614_s7 + $0x38] sm:$0xff]  ;;  %v1200_v56 = vld [vmem:[%s2614_s7 + $0x40] sm:$0xff] }
 0x345   :  { %v1124_v58 = vpop.f32.mrb[56].mxu0  ;;  %1726 = vmatprep.subr.bf16.mxu0 %v1770_v5  ;;  %1745 = vmatprep.subr.bf16.mxu1 %v1770_v5 }
 0x346   :  { %v1125_v59 = vadd.f32 %v1124_v58, %v906_v57  ;;  %v1126_v60 = vpop.f32.mrb[57].mxu0  ;;  %v1203_v57 = vld [vmem:[%s2614_s7 + $0x58] sm:$0xff]  ;;  %v1202_v58 = vld [vmem:[%s2614_s7 + $0x50] sm:$0xff] }
 0x347   :  { %v1204_v60 = vld [vmem:[%s2614_s7 + $0x60] sm:$0xff] }
 0x348   :  { %v1182_v62 = vmax.f32 %v1125_v59, 0.0  ;;  %v1205_v59 = vld [vmem:[%s2614_s7 + $0x68] sm:$0xff] }
 0x349   :  { %v1129_v63 = vpop.f32.mrb[58].mxu0 }
 0x34a   :  { %v1727_v0 = vpack.c.bf16 %v1182_v62, %v1181_v61  ;;  %v1131_v1 = vpop.f32.mrb[59].mxu0  ;;  %v1130_v3 = vadd.f32 %v1129_v63, %v911_v2  ;;  %v1207_v61 = vld [vmem:[%s2614_s7 + $0x78] sm:$0xff]  ;;  %v1206_v62 = vld [vmem:[%s2614_s7 + $0x70] sm:$0xff]  ;;  %v1209_v63 = vld [vmem:[%s2614_s7 + $0x88] sm:$0xff] }
 0x34b   :  { %v1211_v1 = vld [vmem:[%s2614_s7 + $0x98] sm:$0xff]  ;;  %v1210_v2 = vld [vmem:[%s2614_s7 + $0x90] sm:$0xff] }
 0x34c   :  { %1728 = vmatpush1.bf16.msra.mxu0 %v1727_v0  ;;  %1755 = vmatpush1.bf16.msra.mxu1 %v1727_v0  ;;  %v1183_v10 = vmax.f32 %v1130_v3, 0.0  ;;  %v1208_v0 = vld [vmem:[%s2614_s7 + $0x80] sm:$0xff]  ;;  %v1213_v3 = vld [vmem:[%s2614_s7 + $0xa8] sm:$0xff] }
 0x34d   :  { %v1134_v6 = vpop.f32.mrb[60].mxu0  ;;  %1729 = vmatprep.subr.bf16.mxu0 %v1770_v5  ;;  %1746 = vmatprep.subr.bf16.mxu1 %v1770_v5 }
 0x34e   :  { %v1135_v8 = vadd.f32 %v1134_v6, %v916_v4  ;;  %v1136_v9 = vpop.f32.mrb[61].mxu0  ;;  %v1212_v4 = vld [vmem:[%s2614_s7 + $0xa0] sm:$0xff]  ;;  %v1215_v6 = vld [vmem:[%s2614_s7 + $0xb8] sm:$0xff] }
 0x34f   :  { %v1217_v9 = vld [vmem:[%s2614_s7 + $0xc8] sm:$0xf] }
 0x350   :  { %v1184_v11 = vmax.f32 %v1135_v8, 0.0  ;;  %v1214_v8 = vld [vmem:[%s2614_s7 + $0xb0] sm:$0xff] }
 0x351   :  { %v1139_v12 = vpop.f32.mrb[62].mxu0 }
 0x352   :  { %v1730_v13 = vpack.c.bf16 %v1184_v11, %v1183_v10  ;;  %v1141_v14 = vpop.f32.mrb[63].mxu0  ;;  %v1140_v16 = vadd.f32 %v1139_v12, %v921_v15  ;;  %v1216_v10 = vld [vmem:[%s2614_s7 + $0xc0] sm:$0xf]  ;;  %v1234_v11 = vpop.permute.xlu1 %1233 }
 0x353   :  { %v1239_v12 = vpop.permute.xlu0 %1238 }
 0x354   :  { %1731 = vmatpush1.bf16.msra.mxu0 %v1730_v13  ;;  %1756 = vmatpush1.bf16.msra.mxu1 %v1730_v13  ;;  %v1185_v21 = vmax.f32 %v1140_v16, 0.0 }
 0x355   :  { %v1144_v18 = vpop.f32.mrb[64].mxu0  ;;  %1732 = vmatprep.subr.bf16.mxu0 %v1770_v5  ;;  %1747 = vmatprep.subr.bf16.mxu1 %v1770_v5 }
 0x356   :  { %v1145_v19 = vadd.f32 %v1144_v18, %v926_v17  ;;  %v1146_v20 = vpop.f32.mrb[65].mxu0 }
 0x358   :  { %v1186_v22 = vmax.f32 %v1145_v19, 0.0 }
 0x359   :  { %v1149_v23 = vpop.f32.mrb[66].mxu0 }
 0x35a   :  { %v1733_v24 = vpack.c.bf16 %v1186_v22, %v1185_v21  ;;  %v1151_v25 = vpop.f32.mrb[67].mxu0  ;;  %v1150_v27 = vadd.f32 %v1149_v23, %v931_v26  ;;  %v1244_v21 = vpop.permute.xlu1 %1243 }
 0x35b   :  { %v1249_v26 = vpop.permute.xlu0 %1248 }
 0x35c   :  { %1734 = vmatpush1.bf16.msra.mxu0 %v1733_v24  ;;  %1757 = vmatpush1.bf16.msra.mxu1 %v1733_v24  ;;  %v1187_v32 = vmax.f32 %v1150_v27, 0.0 }
 0x35d   :  { %v1154_v29 = vpop.f32.mrb[68].mxu0  ;;  %1735 = vmatprep.subr.bf16.mxu0 %v1770_v5  ;;  %1748 = vmatprep.subr.bf16.mxu1 %v1770_v5 }
 0x35e   :  { %v1155_v30 = vadd.f32 %v1154_v29, %v936_v28  ;;  %v1156_v31 = vpop.f32.mrb[69].mxu0 }
 0x35f   :  { %v1254_v31 = vpop.permute.xlu1 %1253 }
 0x360   :  { %v1188_v33 = vmax.f32 %v1155_v30, 0.0 }
 0x361   :  { %v1159_v34 = vpop.f32.mrb[70].mxu0 }
 0x362   :  { %v1736_v35 = vpack.c.bf16 %v1188_v33, %v1187_v32  ;;  %v1161_v36 = vpop.f32.mrb[71].mxu0  ;;  %v1160_v38 = vadd.f32 %v1159_v34, %v941_v37 }
 0x363   :  { %v1259_v36 = vpop.permute.xlu0 %1258 }
 0x364   :  { %1737 = vmatpush1.bf16.msra.mxu0 %v1736_v35  ;;  %1758 = vmatpush1.bf16.msra.mxu1 %v1736_v35  ;;  %v1189_v43 = vmax.f32 %v1160_v38, 0.0 }
 0x365   :  { %v1164_v40 = vpop.f32.mrb[72].mxu0  ;;  %1738 = vmatprep.subr.bf16.mxu0 %v1770_v5  ;;  %1749 = vmatprep.subr.bf16.mxu1 %v1770_v5  ;;  %v1192_v5 = vld [vmem:[%s2614_s7] sm:$0xff] }
 0x366   :  { %v1165_v41 = vadd.f32 %v1164_v40, %v946_v39  ;;  %v1166_v42 = vpop.f32.mrb[73].mxu0 }
 0x368   :  { %v1190_v44 = vmax.f32 %v1165_v41, 0.0  ;;  %v1264_v41 = vpop.permute.xlu1 %1263 }
 0x369   :  { %v1169_v46 = vpop.f32.mrb[74].mxu0 }
 0x36a   :  { %v1739_v47 = vpack.c.bf16 %v1190_v44, %v1189_v43  ;;  %v1170_v48 = vadd.f32 %v1169_v46, %v951_v45  ;;  %v1171_v49 = vpop.f32.mrb[75].mxu0  ;;  %v1269_v46 = vpop.permute.xlu0 %1268 }
 0x36c   :  { %1740 = vmatpush1.bf16.msra.mxu0 %v1739_v47  ;;  %1759 = vmatpush1.bf16.msra.mxu1 %v1739_v47  ;;  %v1191_v50 = vmax.f32 %v1170_v48, 0.0 }
 0x36d   :  { %1374 = vmatprep.subr.mxu0 %v1772_v7  ;;  %1750 = vmatprep.subr.mxu1 %v1772_v7  ;;  %v1196_v7 = vld [vmem:[%s2614_s7 + $0x20] sm:$0xff] }
 0x370   :  { %1560 = vmatpush1.msk.msra.mxu0 %vm618_vm6, %v1191_v50  ;;  %1760 = vmatpush1.msk.msra.mxu1 %vm618_vm6, %v1191_v50 }
 0x371   :  { %1403 = vmatmul.mubr.f32.vlgmr.msra.gmra.mrb[76].mxu0 %v1192_v5  ;;  %1408 = vmatmul.mubr.f32.vlgmr.msra.gmra.mrb[38].mxu1 %v1194_v51  ;;  %v1274_v5 = vpop.permute.xlu1 %1273 }
 0x372   :  { %1563 = vmatprep.mubr.msk.f32.mxu1 %vm560_vm5, %v1197_v52 }
 0x375   :  { %1413 = vmatmul.mubr.f32.gmra.mrb[40].mxu1 %v1196_v7 }
 0x376   :  { %1564 = vmatprep.mubr.msk.f32.mxu1 %vm560_vm5, %v1199_v53 }
 0x379   :  { %1418 = vmatmul.mubr.f32.gmra.mrb[42].mxu1 %v1198_v54  ;;  %v1279_v54 = vpop.permute.xlu0 %1278 }
 0x37a   :  { %1565 = vmatprep.mubr.msk.f32.mxu1 %vm560_vm5, %v1201_v55 }
 0x37d   :  { %1423 = vmatmul.mubr.f32.gmra.mrb[44].mxu1 %v1200_v56 }
 0x37e   :  { %1566 = vmatprep.mubr.msk.f32.mxu1 %vm560_vm5, %v1203_v57 }
 0x381   :  { %1428 = vmatmul.mubr.f32.gmra.mrb[46].mxu1 %v1202_v58 }
 0x382   :  { %1567 = vmatprep.mubr.msk.f32.mxu1 %vm560_vm5, %v1205_v59  ;;  %v1284_v59 = vpop.permute.xlu1 %1283 }
 0x385   :  { %1433 = vmatmul.mubr.f32.gmra.mrb[48].mxu1 %v1204_v60 }
 0x386   :  { %1568 = vmatprep.mubr.msk.f32.mxu1 %vm560_vm5, %v1207_v61 }
 0x389   :  { %1438 = vmatmul.mubr.f32.gmra.mrb[50].mxu1 %v1206_v62 }
 0x38a   :  { %1569 = vmatprep.mubr.msk.f32.mxu1 %vm560_vm5, %v1209_v63 }
 0x38d   :  { %1443 = vmatmul.mubr.f32.gmra.mrb[52].mxu1 %v1208_v0  ;;  %v1289_v0 = vpop.permute.xlu0 %1288 }
 0x38e   :  { %1570 = vmatprep.mubr.msk.f32.mxu1 %vm560_vm5, %v1211_v1 }
 0x391   :  { %1448 = vmatmul.mubr.f32.gmra.mrb[54].mxu1 %v1210_v2 }
 0x392   :  { %1571 = vmatprep.mubr.msk.f32.mxu1 %vm560_vm5, %v1213_v3 }
 0x395   :  { %1453 = vmatmul.mubr.f32.gmra.mrb[56].mxu1 %v1212_v4 }
 0x396   :  { %1572 = vmatprep.mubr.msk.f32.mxu1 %vm560_vm5, %v1215_v6  ;;  %v1294_v6 = vpop.permute.xlu1 %1293 }
 0x399   :  { %1458 = vmatmul.mubr.f32.gmra.mrb[58].mxu1 %v1214_v8 }
 0x39a   :  { %1573 = vmatprep.mubr.msk.f32.mxu1 %vm560_vm5, %v1217_v9 }
 0x39d   :  { %1463 = vmatmul.mubr.f32.gmra.mrb[60].mxu1 %v1216_v10 }
 0x444   :  { %v1404_v13 = vpop.f32.mrb[76].mxu0  ;;  %v1409_v14 = vpop.f32.mrb[38].mxu1 }
 0x445   :  { %v1405_v15 = vadd.f32 %v1404_v13, %v1234_v11  ;;  %v1410_v16 = vadd.f32 %v1409_v14, %v1239_v12  ;;  %v1411_v17 = vpop.f32.mrb[39].mxu1  ;;  %v1406_v18 = vpop.f32.mrb[77].mxu0 }
 0x447   :  { %v1468_v19 = vmax.f32 %v1405_v15, 0.0  ;;  %v1469_v20 = vmax.f32 %v1410_v16, 0.0 }
 0x448   :  { %v1414_v22 = vpop.f32.mrb[40].mxu1 }
 0x449   :  { %1482 = vst.msk [vmem:[%s2615_s9] sm:$0xff] %vm1481_vm7, %v1468_v19  ;;  %1483 = vst.msk [vmem:[%s2615_s9 + $0x8] sm:$0xff] %vm1481_vm7, %v1469_v20  ;;  %v1415_v23 = vadd.f32 %v1414_v22, %v1244_v21  ;;  %v1416_v24 = vpop.f32.mrb[41].mxu1 }
 0x44b   :  { %v1470_v25 = vmax.f32 %v1415_v23, 0.0 }
 0x44c   :  { %v1419_v27 = vpop.f32.mrb[42].mxu1 }
 0x44d   :  { %1484 = vst.msk [vmem:[%s2615_s9 + $0x10] sm:$0xff] %vm1481_vm7, %v1470_v25  ;;  %v1420_v28 = vadd.f32 %v1419_v27, %v1249_v26  ;;  %v1421_v29 = vpop.f32.mrb[43].mxu1 }
 0x44f   :  { %v1471_v30 = vmax.f32 %v1420_v28, 0.0 }
 0x450   :  { %v1424_v32 = vpop.f32.mrb[44].mxu1 }
 0x451   :  { %1485 = vst.msk [vmem:[%s2615_s9 + $0x18] sm:$0xff] %vm1481_vm7, %v1471_v30  ;;  %v1425_v33 = vadd.f32 %v1424_v32, %v1254_v31  ;;  %v1426_v34 = vpop.f32.mrb[45].mxu1 }
 0x453   :  { %v1472_v35 = vmax.f32 %v1425_v33, 0.0 }
 0x454   :  { %v1429_v37 = vpop.f32.mrb[46].mxu1 }
 0x455   :  { %1486 = vst.msk [vmem:[%s2615_s9 + $0x20] sm:$0xff] %vm1481_vm7, %v1472_v35  ;;  %v1430_v38 = vadd.f32 %v1429_v37, %v1259_v36  ;;  %v1431_v39 = vpop.f32.mrb[47].mxu1 }
 0x457   :  { %v1473_v40 = vmax.f32 %v1430_v38, 0.0 }
 0x458   :  { %v1434_v42 = vpop.f32.mrb[48].mxu1 }
 0x459   :  { %1487 = vst.msk [vmem:[%s2615_s9 + $0x28] sm:$0xff] %vm1481_vm7, %v1473_v40  ;;  %v1435_v43 = vadd.f32 %v1434_v42, %v1264_v41  ;;  %v1436_v44 = vpop.f32.mrb[49].mxu1 }
 0x45b   :  { %v1474_v45 = vmax.f32 %v1435_v43, 0.0 }
 0x45c   :  { %v1439_v47 = vpop.f32.mrb[50].mxu1 }
 0x45d   :  { %1488 = vst.msk [vmem:[%s2615_s9 + $0x30] sm:$0xff] %vm1481_vm7, %v1474_v45  ;;  %v1440_v48 = vadd.f32 %v1439_v47, %v1269_v46  ;;  %v1441_v49 = vpop.f32.mrb[51].mxu1 }
 0x45f   :  { %v1475_v50 = vmax.f32 %v1440_v48, 0.0 }
 0x460   :  { %v1444_v51 = vpop.f32.mrb[52].mxu1 }
 0x461   :  { %1489 = vst.msk [vmem:[%s2615_s9 + $0x38] sm:$0xff] %vm1481_vm7, %v1475_v50  ;;  %v1445_v52 = vadd.f32 %v1444_v51, %v1274_v5  ;;  %v1446_v7 = vpop.f32.mrb[53].mxu1 }
 0x463   :  { %v1476_v53 = vmax.f32 %v1445_v52, 0.0 }
 0x464   :  { %v1449_v55 = vpop.f32.mrb[54].mxu1 }
 0x465   :  { %1490 = vst.msk [vmem:[%s2615_s9 + $0x40] sm:$0xff] %vm1481_vm7, %v1476_v53  ;;  %v1450_v56 = vadd.f32 %v1449_v55, %v1279_v54  ;;  %v1451_v57 = vpop.f32.mrb[55].mxu1 }
 0x467   :  { %v1477_v58 = vmax.f32 %v1450_v56, 0.0 }
 0x468   :  { %v1454_v60 = vpop.f32.mrb[56].mxu1 }
 0x469   :  { %1491 = vst.msk [vmem:[%s2615_s9 + $0x48] sm:$0xff] %vm1481_vm7, %v1477_v58  ;;  %v1455_v61 = vadd.f32 %v1454_v60, %v1284_v59  ;;  %v1456_v62 = vpop.f32.mrb[57].mxu1 }
 0x46b   :  { %v1478_v63 = vmax.f32 %v1455_v61, 0.0 }
 0x46c   :  { %v1459_v1 = vpop.f32.mrb[58].mxu1 }
 0x46d   :  { %1492 = vst.msk [vmem:[%s2615_s9 + $0x50] sm:$0xff] %vm1481_vm7, %v1478_v63  ;;  %v1460_v2 = vadd.f32 %v1459_v1, %v1289_v0  ;;  %v1461_v3 = vpop.f32.mrb[59].mxu1 }
 0x46f   :  { %v1479_v4 = vmax.f32 %v1460_v2, 0.0 }
 0x470   :  { %v1464_v8 = vpop.f32.mrb[60].mxu1 }
 0x471   :  { %1493 = vst.msk [vmem:[%s2615_s9 + $0x58] sm:$0xff] %vm1481_vm7, %v1479_v4  ;;  %v1465_v9 = vadd.f32 %v1464_v8, %v1294_v6  ;;  %v1466_v10 = vpop.f32.mrb[61].mxu1 }
 0x473   :  { %v1480_v11 = vmax.f32 %v1465_v9, 0.0 }
 0x475   :  { %1495 = vst.msk [vmem:[%s2615_s9 + $0x60] sm:$0xf] %vm1494_vm8, %v1480_v11 }

</bundles_post_ra>
